<compile_context>
chip_gen: v7x
topology: tpu7x:2x2x1
jax: 0.10.0
libtpu: 0.0.40
codegen_flags: <defaults>
</compile_context>

<pallas_src>
import functools
import math

import jax
import jax.numpy as jnp
from jax import lax
from jax.experimental import pallas as pl
from jax.experimental.pallas import tpu as pltpu


# ------------------------------ Pallas kernels ------------------------------ #

def _sepconv_stage_kernel(x_ref, scale_ref, shift_ref, dwt_ref, pwb_ref,
                          y_ref, st_ref, zbuf_ref, *,
                          k, H, W, Cin, Cout, cdtype):
    """(affine-free BN | identity) -> ReLU -> depthwise kxk conv -> 1x1 conv.

    One image per grid step as a (H, W*Cin) slab (channels tiled along the
    128-lane axis).  Also emits per-image partial BatchNorm statistics
    (sum / sum-of-squares reduced over H only) of this stage's output.
    """
    p = k // 2
    WCi = W * Cin

    # BN (scale/shift precomputed in the wrapper; identity for stage 1) + ReLU.
    # Element-wise math stays in f32 (v5e-safe).
    z = jnp.maximum(
        x_ref[0].astype(jnp.float32) * scale_ref[...] + shift_ref[...], 0.0)

    # Zero halo in a small VMEM scratch (padding must happen AFTER BN+ReLU; no
    # padded/dilated tensor ever touches HBM).
    zbuf_ref[...] = jnp.zeros_like(zbuf_ref)
    zbuf_ref[p:p + H, p * Cin:p * Cin + WCi] = z

    # Depthwise conv: k*k lane-dense VPU FMAs. Tap (kh, kw) is a (kh-row,
    # kw*Cin-lane) shift of the padded slab times the per-channel weight tiled
    # along W.  f32 accumulate.
    acc = jnp.zeros((H, WCi), jnp.float32)
    for kh in range(k):                          # static unroll (k compile-time)
        for kw in range(k):
            tap = zbuf_ref[kh:kh + H, kw * Cin:kw * Cin + WCi]
            acc = acc + tap * dwt_ref[kh * k + kw:kh * k + kw + 1, :]

    # Pointwise 1x1 conv: ONE MXU matmul per image against the block-diagonal
    # kron(I_W, pw) weight -> contraction = W*Cin, output already lane-dense.
    y = jnp.dot(acc.astype(cdtype), pwb_ref[...],
                preferred_element_type=jnp.float32)          # (H, W*Cout) f32

    y_ref[...] = y[None].astype(y_ref.dtype)

    # Per-image partial stats from the f32 accumulator (wrapper reduces over N
    # and W).  Per-image outputs keep the batch grid axis "parallel".
    s0 = jnp.sum(y, axis=0, keepdims=True)                   # (1, W*Cout)
    s1 = jnp.sum(y * y, axis=0, keepdims=True)               # (1, W*Cout)
    st_ref[...] = jnp.concatenate([s0, s1], axis=0)[None]


def _bn_apply_kernel(y_ref, scale_ref, shift_ref, o_ref):
    """Final BatchNorm apply (affine=False, no ReLU): pure lane-dense FMA."""
    o_ref[...] = y_ref[...].astype(jnp.float32) * scale_ref[...] + shift_ref[...]


# ------------------------------ weight helpers ------------------------------ #

def _tile_depthwise(dw, W):
    """(C,1,k,k) depthwise weight -> (k*k, W*C); row kh*k+kw = tile_W(dw[:,0,kh,kw])."""
    C, _, k, _ = dw.shape
    d = jnp.transpose(dw[:, 0], (1, 2, 0)).reshape(k * k, C)
    return jnp.tile(d, (1, W)).astype(jnp.float32)


def _blockdiag_pointwise(pw, W, dtype):
    """(Cout,Cin,1,1) 1x1 weight -> block-diagonal (W*Cin, W*Cout) = kron(I_W, pw^T)."""
    mat = pw[:, :, 0, 0].T.astype(jnp.float32)               # (Cin, Cout)
    return jnp.kron(jnp.eye(W, dtype=jnp.float32), mat).astype(dtype)


def _bn_scale_shift(st, W, C, count, eps):
    """Reduce per-image (N,2,W*C) partial stats -> per-channel scale/shift."""
    s = jnp.sum(st, axis=0).reshape(2, W, C).sum(axis=1)     # (2, C)
    mean = s[0] / count
    # Single-pass E[x^2]-E[x]^2; fine at these magnitudes (see review note).
    var = jnp.maximum(s[1] / count - mean * mean, 0.0)
    scale = lax.rsqrt(var + eps)                             # affine=False: gamma=1
    shift = -mean * scale                                    # beta=0
    return scale, shift


# --------------------------- pallas_call wrappers ---------------------------- #

def _run_stage(xflat, scale_t, shift_t, dw_t, pw_b, *, k, H, W, Cin, Cout, cdtype):
    N = xflat.shape[0]
    p = k // 2
    Hp, Wpc = H + 2 * p, (W + 2 * p) * Cin
    WCi, WCo = W * Cin, W * Cout

    kern = functools.partial(_sepconv_stage_kernel, k=k, H=H, W=W,
                             Cin=Cin, Cout=Cout, cdtype=cdtype)
    y, st = pl.pallas_call(
        kern,
        out_shape=(jax.ShapeDtypeStruct((N, H, WCo), cdtype),
                   jax.ShapeDtypeStruct((N, 2, WCo), jnp.float32)),
        grid_spec=pltpu.PrefetchScalarGridSpec(
            num_scalar_prefetch=0,
            grid=(N,),
            in_specs=[
                pl.BlockSpec((1, H, WCi), lambda n: (n, 0, 0)),
                pl.BlockSpec((1, WCi), lambda n: (0, 0)),
                pl.BlockSpec((1, WCi), lambda n: (0, 0)),
                pl.BlockSpec((k * k, WCi), lambda n: (0, 0)),
                pl.BlockSpec((WCi, WCo), lambda n: (0, 0)),
            ],
            out_specs=[
                pl.BlockSpec((1, H, WCo), lambda n: (n, 0, 0)),
                pl.BlockSpec((1, 2, WCo), lambda n: (n, 0, 0)),
            ],
            scratch_shapes=[pltpu.VMEM((Hp, Wpc), jnp.float32)],
        ),
        compiler_params=pltpu.CompilerParams(
            dimension_semantics=("parallel",)),   # per-image stats -> no serial dep
    )(xflat, scale_t, shift_t, dw_t, pw_b)
    return y, st


def _run_bn_apply(y2, scale_t, shift_t, N, H, WCo):
    # One large flattened lane-dense tile (tiny here); tile rows for big inputs.
    R = N * H
    yf = y2.reshape(R, WCo)
    return pl.pallas_call(
        _bn_apply_kernel,
        out_shape=jax.ShapeDtypeStruct((R, WCo), jnp.float32),
        grid_spec=pltpu.PrefetchScalarGridSpec(
            num_scalar_prefetch=0,
            grid=(1,),
            in_specs=[pl.BlockSpec((R, WCo), lambda i: (0, 0)),
                      pl.BlockSpec((1, WCo), lambda i: (0, 0)),
                      pl.BlockSpec((1, WCo), lambda i: (0, 0))],
            out_specs=pl.BlockSpec((R, WCo), lambda i: (0, 0)),
        ),
        compiler_params=pltpu.CompilerParams(
            dimension_semantics=("parallel",)),
    )(yf, scale_t, shift_t)


def sepconv_forward(x, dw1, pw1, dw2, pw2, *, kernel_size, eps=1e-5,
                    compute_dtype=jnp.bfloat16):
    """SepConv forward. x: (N,Cin,H,W); dw*: (C,1,k,k); pw*: (Cout,Cin,1,1)."""
    N, Cin, H, W = x.shape
    Cout = pw2.shape[0]
    k = kernel_size
    count = float(N * H * W)

    # Input layout prep (small, fused by XLA): NCHW -> lane-dense (N, H, W*Cin).
    xf = jnp.transpose(x, (0, 2, 3, 1)).reshape(N, H, W * Cin).astype(jnp.float32)

    # Weight prep (tiny, plain JAX).
    dw1_t = _tile_depthwise(dw1, W)                      # (k*k, W*Cin) f32
    dw2_t = _tile_depthwise(dw2, W)
    pw1_b = _blockdiag_pointwise(pw1, W, compute_dtype)  # (W*Cin, W*Cin)
    pw2_b = _blockdiag_pointwise(pw2, W, compute_dtype)  # (W*Cin, W*Cout)
    ones = jnp.ones((1, W * Cin), jnp.float32)
    zeros = jnp.zeros((1, W * Cin), jnp.float32)

    # Stage 1: ReLU -> dw1 -> pw1 (+ per-image partial stats for BN1).
    y1, st1 = _run_stage(xf, ones, zeros, dw1_t, pw1_b,
                         k=k, H=H, W=W, Cin=Cin, Cout=Cin, cdtype=compute_dtype)
    scale1, shift1 = _bn_scale_shift(st1, W, Cin, count, eps)

    # Stage 2: BN1 -> ReLU -> dw2 -> pw2 (+ stats for BN2).
    y2, st2 = _run_stage(y1,
                         jnp.tile(scale1, W)[None], jnp.tile(shift1, W)[None],
                         dw2_t, pw2_b,
                         k=k, H=H, W=W, Cin=Cin, Cout=Cout, cdtype=compute_dtype)
    scale2, shift2 = _bn_scale_shift(st2, W, Cout, count, eps)

    # Stage 3: BN2 apply (module ends with BatchNorm, no ReLU).
    out_flat = _run_bn_apply(y2, jnp.tile(scale2, W)[None],
                             jnp.tile(shift2, W)[None], N, H, W * Cout)

    # Final layout conversion back to NCHW (single small XLA transpose).
    return jnp.transpose(out_flat.reshape(N, H, W, Cout), (0, 3, 1, 2))


# ------------------------------- pure-JAX ref -------------------------------- #

def _reference(x, dw1, pw1, dw2, pw2, k, eps=1e-5):
    p = k // 2

    def dwconv(z, w):
        return lax.conv_general_dilated(
            z, w, (1, 1), [(p, p), (p, p)],
            dimension_numbers=("NCHW", "OIHW", "NCHW"),
            feature_group_count=z.shape[1])

    def pwconv(z, w):
        return jnp.einsum("nchw,oc->nohw", z, w[:, :, 0, 0])

    def bn(z):
        m = jnp.mean(z, axis=(0, 2, 3), keepdims=True)
        v = jnp.mean((z - m) ** 2, axis=(0, 2, 3), keepdims=True)
        return (z - m) * lax.rsqrt(v + eps)                 # affine=False

    z = jnp.maximum(x, 0.0)
    z = bn(pwconv(dwconv(z, dw1), pw1))
    z = jnp.maximum(z, 0.0)
    z = bn(pwconv(dwconv(z, dw2), pw2))
    return z


# ----------------------------------- main ------------------------------------ #

if __name__ == "__main__":
    # SepConv(C_in=4, C_out=8, kernel_size=3, stride=1, affine=False); x: (2,4,16,16)
    N, Cin, Cout, H, W, K = 2, 4, 8, 16, 16, 3

    key = jax.random.PRNGKey(0)
    kx, k1, k2, k3, k4 = jax.random.split(key, 5)
    x = jax.random.normal(kx, (N, Cin, H, W), jnp.float32)
    # PyTorch weight layouts: depthwise (C,1,k,k); pointwise (Cout,Cin,1,1).
    dw1 = jax.random.normal(k1, (Cin, 1, K, K), jnp.float32) / math.sqrt(K * K)
    pw1 = jax.random.normal(k2, (Cin, Cin, 1, 1), jnp.float32) / math.sqrt(Cin)
    dw2 = jax.random.normal(k3, (Cin, 1, K, K), jnp.float32) / math.sqrt(K * K)
    pw2 = jax.random.normal(k4, (Cout, Cin, 1, 1), jnp.float32) / math.sqrt(Cin)

    ref = _reference(x, dw1, pw1, dw2, pw2, K)

    # f32 compute path: tight check against the pure-JAX reference.
    fwd32 = jax.jit(functools.partial(sepconv_forward, kernel_size=K,
                                      compute_dtype=jnp.float32))
    out32 = fwd32(x, dw1, pw1, dw2, pw2)
    jax.block_until_ready(out32)
    assert out32.shape == (N, Cout, H, W), out32.shape
    if not jnp.allclose(out32, ref, atol=1e-4, rtol=1e-4):
        raise AssertionError("Pallas SepConv (f32) does not match reference")

    # bf16 MXU-operand / bf16-intermediate path (perf default): looser tolerance
    # reflects bf16 rounding of the matmul operands and the y1/y2 intermediates.
    fwd16 = jax.jit(functools.partial(sepconv_forward, kernel_size=K,
                                      compute_dtype=jnp.bfloat16))
    out16 = fwd16(x, dw1, pw1, dw2, pw2)
    jax.block_until_ready(out16)
    if not jnp.allclose(out16, ref, atol=5e-2, rtol=5e-2):
        raise AssertionError("Pallas SepConv (bf16) does not match reference")

    # TODO(synk): BatchNorm2d running_mean/running_var in-place updates (training
    # side effect, no impact on forward output) are not modeled.
    # TODO(synk): SepConv's optional stride>1 first depthwise conv is not
    # implemented (module default stride=1 is what this script exercises).
    print("KERNEL_OK")
</pallas_src>

<mosaic_0001>
module attributes {stable_mosaic.version = 11 : i64} {
  func.func @_sepconv_stage_kernel(%arg0: i32, %arg1: memref<1x16x64xf32, #tpu.memory_space<vmem>>, %arg2: memref<1x64xf32, #tpu.memory_space<vmem>>, %arg3: memref<1x64xf32, #tpu.memory_space<vmem>>, %arg4: memref<9x64xf32, #tpu.memory_space<vmem>>, %arg5: memref<64x64xf32, #tpu.memory_space<vmem>>, %arg6: memref<1x16x64xf32, #tpu.memory_space<vmem>>, %arg7: memref<1x2x64xf32, #tpu.memory_space<vmem>>, %arg8: memref<18x72xf32, #tpu.memory_space<vmem>>) attributes {dimension_semantics = [#tpu.dimension_semantics<parallel>], iteration_bounds = array<i64: 2>, scalar_prefetch = 0 : i64, scratch_operands = 1 : i64, tpu.core_type = #tpu.core_type<tc>, window_params = [{transform_indices = @transform_0, window_bounds = array<i64: 1, 16, 64>}, {pipeline_mode = #tpu.pipeline_mode<synchronous>, transform_indices = @transform_1, window_bounds = array<i64: 1, 64>}, {pipeline_mode = #tpu.pipeline_mode<synchronous>, transform_indices = @transform_2, window_bounds = array<i64: 1, 64>}, {pipeline_mode = #tpu.pipeline_mode<synchronous>, transform_indices = @transform_3, window_bounds = array<i64: 9, 64>}, {pipeline_mode = #tpu.pipeline_mode<synchronous>, transform_indices = @transform_4, window_bounds = array<i64: 64, 64>}, {transform_indices = @transform_5, window_bounds = array<i64: 1, 16, 64>}, {transform_indices = @transform_6, window_bounds = array<i64: 1, 2, 64>}]} {
    %c0 = arith.constant 0 : index
    %c0_0 = arith.constant 0 : index
    %c0_1 = arith.constant 0 : index
    %0 = vector.load %arg1[%c0, %c0_0, %c0_1] : memref<1x16x64xf32, #tpu.memory_space<vmem>>, vector<1x16x64xf32>
    %1 = vector.shape_cast %0 : vector<1x16x64xf32> to vector<16x64xf32>
    %c0_2 = arith.constant 0 : index
    %c0_3 = arith.constant 0 : index
    %2 = vector.load %arg2[%c0_2, %c0_3] : memref<1x64xf32, #tpu.memory_space<vmem>>, vector<1x64xf32>
    %3 = vector.broadcast %2 : vector<1x64xf32> to vector<16x64xf32>
    %4 = arith.mulf %1, %3 : vector<16x64xf32>
    %c0_4 = arith.constant 0 : index
    %c0_5 = arith.constant 0 : index
    %5 = vector.load %arg3[%c0_4, %c0_5] : memref<1x64xf32, #tpu.memory_space<vmem>>, vector<1x64xf32>
    %6 = vector.broadcast %5 : vector<1x64xf32> to vector<16x64xf32>
    %7 = arith.addf %4, %6 : vector<16x64xf32>
    %cst = arith.constant 0.000000e+00 : f32
    %8 = vector.broadcast %cst : f32 to vector<16x64xf32>
    %9 = arith.maximumf %7, %8 : vector<16x64xf32>
    %cst_6 = arith.constant 0.000000e+00 : f32
    %10 = vector.broadcast %cst_6 : f32 to vector<18x72xf32>
    %c0_7 = arith.constant 0 : index
    %c0_8 = arith.constant 0 : index
    %11 = vector.load %arg8[%c0_7, %c0_8] : memref<18x72xf32, #tpu.memory_space<vmem>>, vector<18x72xf32>
    tpu.vector_store %arg8[%c0_7, %c0_8], %10 {strides = array<i32>} : memref<18x72xf32, #tpu.memory_space<vmem>>, vector<18x72xf32>,
    %c1 = arith.constant 1 : index
    %c4 = arith.constant 4 : index
    %12 = vector.load %arg8[%c1, %c4] : memref<18x72xf32, #tpu.memory_space<vmem>>, vector<16x64xf32>
    tpu.vector_store %arg8[%c1, %c4], %9 {strides = array<i32>} : memref<18x72xf32, #tpu.memory_space<vmem>>, vector<16x64xf32>,
    %cst_9 = arith.constant 0.000000e+00 : f32
    %13 = vector.broadcast %cst_9 : f32 to vector<16x64xf32>
    %c0_10 = arith.constant 0 : index
    %c0_11 = arith.constant 0 : index
    %14 = vector.load %arg8[%c0_10, %c0_11] : memref<18x72xf32, #tpu.memory_space<vmem>>, vector<16x64xf32>
    %c0_12 = arith.constant 0 : index
    %c0_13 = arith.constant 0 : index
    %15 = vector.load %arg4[%c0_12, %c0_13] : memref<9x64xf32, #tpu.memory_space<vmem>>, vector<1x64xf32>
    %16 = vector.broadcast %15 : vector<1x64xf32> to vector<16x64xf32>
    %17 = arith.mulf %14, %16 : vector<16x64xf32>
    %18 = arith.addf %13, %17 : vector<16x64xf32>
    %c0_14 = arith.constant 0 : index
    %c4_15 = arith.constant 4 : index
    %19 = vector.load %arg8[%c0_14, %c4_15] : memref<18x72xf32, #tpu.memory_space<vmem>>, vector<16x64xf32>
    %c1_16 = arith.constant 1 : index
    %c0_17 = arith.constant 0 : index
    %20 = vector.load %arg4[%c1_16, %c0_17] : memref<9x64xf32, #tpu.memory_space<vmem>>, vector<1x64xf32>
    %21 = vector.broadcast %20 : vector<1x64xf32> to vector<16x64xf32>
    %22 = arith.mulf %19, %21 : vector<16x64xf32>
    %23 = arith.addf %18, %22 : vector<16x64xf32>
    %c0_18 = arith.constant 0 : index
    %c8 = arith.constant 8 : index
    %24 = vector.load %arg8[%c0_18, %c8] : memref<18x72xf32, #tpu.memory_space<vmem>>, vector<16x64xf32>
    %c2 = arith.constant 2 : index
    %c0_19 = arith.constant 0 : index
    %25 = vector.load %arg4[%c2, %c0_19] : memref<9x64xf32, #tpu.memory_space<vmem>>, vector<1x64xf32>
    %26 = vector.broadcast %25 : vector<1x64xf32> to vector<16x64xf32>
    %27 = arith.mulf %24, %26 : vector<16x64xf32>
    %28 = arith.addf %23, %27 : vector<16x64xf32>
    %c1_20 = arith.constant 1 : index
    %c0_21 = arith.constant 0 : index
    %29 = vector.load %arg8[%c1_20, %c0_21] : memref<18x72xf32, #tpu.memory_space<vmem>>, vector<16x64xf32>
    %c3 = arith.constant 3 : index
    %c0_22 = arith.constant 0 : index
    %30 = vector.load %arg4[%c3, %c0_22] : memref<9x64xf32, #tpu.memory_space<vmem>>, vector<1x64xf32>
    %31 = vector.broadcast %30 : vector<1x64xf32> to vector<16x64xf32>
    %32 = arith.mulf %29, %31 : vector<16x64xf32>
    %33 = arith.addf %28, %32 : vector<16x64xf32>
    %c1_23 = arith.constant 1 : index
    %c4_24 = arith.constant 4 : index
    %34 = vector.load %arg8[%c1_23, %c4_24] : memref<18x72xf32, #tpu.memory_space<vmem>>, vector<16x64xf32>
    %c4_25 = arith.constant 4 : index
    %c0_26 = arith.constant 0 : index
    %35 = vector.load %arg4[%c4_25, %c0_26] : memref<9x64xf32, #tpu.memory_space<vmem>>, vector<1x64xf32>
    %36 = vector.broadcast %35 : vector<1x64xf32> to vector<16x64xf32>
    %37 = arith.mulf %34, %36 : vector<16x64xf32>
    %38 = arith.addf %33, %37 : vector<16x64xf32>
    %c1_27 = arith.constant 1 : index
    %c8_28 = arith.constant 8 : index
    %39 = vector.load %arg8[%c1_27, %c8_28] : memref<18x72xf32, #tpu.memory_space<vmem>>, vector<16x64xf32>
    %c5 = arith.constant 5 : index
    %c0_29 = arith.constant 0 : index
    %40 = vector.load %arg4[%c5, %c0_29] : memref<9x64xf32, #tpu.memory_space<vmem>>, vector<1x64xf32>
    %41 = vector.broadcast %40 : vector<1x64xf32> to vector<16x64xf32>
    %42 = arith.mulf %39, %41 : vector<16x64xf32>
    %43 = arith.addf %38, %42 : vector<16x64xf32>
    %c2_30 = arith.constant 2 : index
    %c0_31 = arith.constant 0 : index
    %44 = vector.load %arg8[%c2_30, %c0_31] : memref<18x72xf32, #tpu.memory_space<vmem>>, vector<16x64xf32>
    %c6 = arith.constant 6 : index
    %c0_32 = arith.constant 0 : index
    %45 = vector.load %arg4[%c6, %c0_32] : memref<9x64xf32, #tpu.memory_space<vmem>>, vector<1x64xf32>
    %46 = vector.broadcast %45 : vector<1x64xf32> to vector<16x64xf32>
    %47 = arith.mulf %44, %46 : vector<16x64xf32>
    %48 = arith.addf %43, %47 : vector<16x64xf32>
    %c2_33 = arith.constant 2 : index
    %c4_34 = arith.constant 4 : index
    %49 = vector.load %arg8[%c2_33, %c4_34] : memref<18x72xf32, #tpu.memory_space<vmem>>, vector<16x64xf32>
    %c7 = arith.constant 7 : index
    %c0_35 = arith.constant 0 : index
    %50 = vector.load %arg4[%c7, %c0_35] : memref<9x64xf32, #tpu.memory_space<vmem>>, vector<1x64xf32>
    %51 = vector.broadcast %50 : vector<1x64xf32> to vector<16x64xf32>
    %52 = arith.mulf %49, %51 : vector<16x64xf32>
    %53 = arith.addf %48, %52 : vector<16x64xf32>
    %c2_36 = arith.constant 2 : index
    %c8_37 = arith.constant 8 : index
    %54 = vector.load %arg8[%c2_36, %c8_37] : memref<18x72xf32, #tpu.memory_space<vmem>>, vector<16x64xf32>
    %c8_38 = arith.constant 8 : index
    %c0_39 = arith.constant 0 : index
    %55 = vector.load %arg4[%c8_38, %c0_39] : memref<9x64xf32, #tpu.memory_space<vmem>>, vector<1x64xf32>
    %56 = vector.broadcast %55 : vector<1x64xf32> to vector<16x64xf32>
    %57 = arith.mulf %54, %56 : vector<16x64xf32>
    %58 = arith.addf %53, %57 : vector<16x64xf32>
    %c0_40 = arith.constant 0 : index
    %c0_41 = arith.constant 0 : index
    %59 = vector.load %arg5[%c0_40, %c0_41] : memref<64x64xf32, #tpu.memory_space<vmem>>, vector<64x64xf32>
    %cst_42 = arith.constant dense<0.000000e+00> : vector<16x64xf32>
    %60 = tpu.matmul %58, %59, %cst_42 {dimension_numbers = #tpu.dot_dimension_numbers<[1], [0], [0], [1], [0, 0, 1, 1], [], []>} : vector<16x64xf32>, vector<64x64xf32>, vector<16x64xf32> -> vector<16x64xf32>
    %61 = vector.shape_cast %60 : vector<16x64xf32> to vector<1x16x64xf32>
    %c0_43 = arith.constant 0 : index
    %c0_44 = arith.constant 0 : index
    %c0_45 = arith.constant 0 : index
    %62 = vector.load %arg6[%c0_43, %c0_44, %c0_45] : memref<1x16x64xf32, #tpu.memory_space<vmem>>, vector<1x16x64xf32>
    tpu.vector_store %arg6[%c0_43, %c0_44, %c0_45], %61 {strides = array<i32>} : memref<1x16x64xf32, #tpu.memory_space<vmem>>, vector<1x16x64xf32>,
    %cst_46 = arith.constant dense<0.000000e+00> : vector<64xf32>
    %63 = vector.multi_reduction <add>, %60, %cst_46 [0] : vector<16x64xf32> to vector<64xf32>
    %64 = vector.shape_cast %63 : vector<64xf32> to vector<1x64xf32>
    %65 = arith.mulf %60, %60 : vector<16x64xf32>
    %cst_47 = arith.constant dense<0.000000e+00> : vector<64xf32>
    %66 = vector.multi_reduction <add>, %65, %cst_47 [0] : vector<16x64xf32> to vector<64xf32>
    %67 = vector.shape_cast %66 : vector<64xf32> to vector<1x64xf32>
    %68 = tpu.concatenate %64, %67 in 0 : vector<1x64xf32>, vector<1x64xf32> -> vector<2x64xf32>
    %69 = vector.shape_cast %68 : vector<2x64xf32> to vector<1x2x64xf32>
    %c0_48 = arith.constant 0 : index
    %c0_49 = arith.constant 0 : index
    %c0_50 = arith.constant 0 : index
    %70 = vector.load %arg7[%c0_48, %c0_49, %c0_50] : memref<1x2x64xf32, #tpu.memory_space<vmem>>, vector<1x2x64xf32>
    tpu.vector_store %arg7[%c0_48, %c0_49, %c0_50], %69 {strides = array<i32>} : memref<1x2x64xf32, #tpu.memory_space<vmem>>, vector<1x2x64xf32>,
    return
  }
  func.func @transform_0(%arg0: i32) -> (i32, i32, i32) {
    %c0_i32 = arith.constant 0 : i32
    %c0_i32_0 = arith.constant 0 : i32
    %c0_i32_1 = arith.constant 0 : i32
    return %arg0, %c0_i32, %c0_i32_0 : i32, i32, i32
  }
  func.func @transform_1(%arg0: i32) -> (i32, i32) {
    %c0_i32 = arith.constant 0 : i32
    %c0_i32_0 = arith.constant 0 : i32
    %c0_i32_1 = arith.constant 0 : i32
    return %c0_i32, %c0_i32_0 : i32, i32
  }
  func.func @transform_2(%arg0: i32) -> (i32, i32) {
    %c0_i32 = arith.constant 0 : i32
    %c0_i32_0 = arith.constant 0 : i32
    %c0_i32_1 = arith.constant 0 : i32
    return %c0_i32, %c0_i32_0 : i32, i32
  }
  func.func @transform_3(%arg0: i32) -> (i32, i32) {
    %c0_i32 = arith.constant 0 : i32
    %c0_i32_0 = arith.constant 0 : i32
    %c0_i32_1 = arith.constant 0 : i32
    return %c0_i32, %c0_i32_0 : i32, i32
  }
  func.func @transform_4(%arg0: i32) -> (i32, i32) {
    %c0_i32 = arith.constant 0 : i32
    %c0_i32_0 = arith.constant 0 : i32
    %c0_i32_1 = arith.constant 0 : i32
    return %c0_i32, %c0_i32_0 : i32, i32
  }
  func.func @transform_5(%arg0: i32) -> (i32, i32, i32) {
    %c0_i32 = arith.constant 0 : i32
    %c0_i32_0 = arith.constant 0 : i32
    %c0_i32_1 = arith.constant 0 : i32
    return %arg0, %c0_i32, %c0_i32_0 : i32, i32, i32
  }
  func.func @transform_6(%arg0: i32) -> (i32, i32, i32) {
    %c0_i32 = arith.constant 0 : i32
    %c0_i32_0 = arith.constant 0 : i32
    %c0_i32_1 = arith.constant 0 : i32
    return %arg0, %c0_i32, %c0_i32_0 : i32, i32, i32
  }
}

module attributes {stable_mosaic.version = 11 : i64} {
  func.func @_sepconv_stage_kernel(%arg0: i32, %arg1: memref<1x16x64xf32, #tpu.memory_space<vmem>>, %arg2: memref<1x64xf32, #tpu.memory_space<vmem>>, %arg3: memref<1x64xf32, #tpu.memory_space<vmem>>, %arg4: memref<9x64xf32, #tpu.memory_space<vmem>>, %arg5: memref<64x128xf32, #tpu.memory_space<vmem>>, %arg6: memref<1x16x128xf32, #tpu.memory_space<vmem>>, %arg7: memref<1x2x128xf32, #tpu.memory_space<vmem>>, %arg8: memref<18x72xf32, #tpu.memory_space<vmem>>) attributes {dimension_semantics = [#tpu.dimension_semantics<parallel>], iteration_bounds = array<i64: 2>, scalar_prefetch = 0 : i64, scratch_operands = 1 : i64, tpu.core_type = #tpu.core_type<tc>, window_params = [{transform_indices = @transform_0, window_bounds = array<i64: 1, 16, 64>}, {pipeline_mode = #tpu.pipeline_mode<synchronous>, transform_indices = @transform_1, window_bounds = array<i64: 1, 64>}, {pipeline_mode = #tpu.pipeline_mode<synchronous>, transform_indices = @transform_2, window_bounds = array<i64: 1, 64>}, {pipeline_mode = #tpu.pipeline_mode<synchronous>, transform_indices = @transform_3, window_bounds = array<i64: 9, 64>}, {pipeline_mode = #tpu.pipeline_mode<synchronous>, transform_indices = @transform_4, window_bounds = array<i64: 64, 128>}, {transform_indices = @transform_5, window_bounds = array<i64: 1, 16, 128>}, {transform_indices = @transform_6, window_bounds = array<i64: 1, 2, 128>}]} {
    %c0 = arith.constant 0 : index
    %c0_0 = arith.constant 0 : index
    %c0_1 = arith.constant 0 : index
    %0 = vector.load %arg1[%c0, %c0_0, %c0_1] : memref<1x16x64xf32, #tpu.memory_space<vmem>>, vector<1x16x64xf32>
    %1 = vector.shape_cast %0 : vector<1x16x64xf32> to vector<16x64xf32>
    %c0_2 = arith.constant 0 : index
    %c0_3 = arith.constant 0 : index
    %2 = vector.load %arg2[%c0_2, %c0_3] : memref<1x64xf32, #tpu.memory_space<vmem>>, vector<1x64xf32>
    %3 = vector.broadcast %2 : vector<1x64xf32> to vector<16x64xf32>
    %4 = arith.mulf %1, %3 : vector<16x64xf32>
    %c0_4 = arith.constant 0 : index
    %c0_5 = arith.constant 0 : index
    %5 = vector.load %arg3[%c0_4, %c0_5] : memref<1x64xf32, #tpu.memory_space<vmem>>, vector<1x64xf32>
    %6 = vector.broadcast %5 : vector<1x64xf32> to vector<16x64xf32>
    %7 = arith.addf %4, %6 : vector<16x64xf32>
    %cst = arith.constant 0.000000e+00 : f32
    %8 = vector.broadcast %cst : f32 to vector<16x64xf32>
    %9 = arith.maximumf %7, %8 : vector<16x64xf32>
    %cst_6 = arith.constant 0.000000e+00 : f32
    %10 = vector.broadcast %cst_6 : f32 to vector<18x72xf32>
    %c0_7 = arith.constant 0 : index
    %c0_8 = arith.constant 0 : index
    %11 = vector.load %arg8[%c0_7, %c0_8] : memref<18x72xf32, #tpu.memory_space<vmem>>, vector<18x72xf32>
    tpu.vector_store %arg8[%c0_7, %c0_8], %10 {strides = array<i32>} : memref<18x72xf32, #tpu.memory_space<vmem>>, vector<18x72xf32>,
    %c1 = arith.constant 1 : index
    %c4 = arith.constant 4 : index
    %12 = vector.load %arg8[%c1, %c4] : memref<18x72xf32, #tpu.memory_space<vmem>>, vector<16x64xf32>
    tpu.vector_store %arg8[%c1, %c4], %9 {strides = array<i32>} : memref<18x72xf32, #tpu.memory_space<vmem>>, vector<16x64xf32>,
    %cst_9 = arith.constant 0.000000e+00 : f32
    %13 = vector.broadcast %cst_9 : f32 to vector<16x64xf32>
    %c0_10 = arith.constant 0 : index
    %c0_11 = arith.constant 0 : index
    %14 = vector.load %arg8[%c0_10, %c0_11] : memref<18x72xf32, #tpu.memory_space<vmem>>, vector<16x64xf32>
    %c0_12 = arith.constant 0 : index
    %c0_13 = arith.constant 0 : index
    %15 = vector.load %arg4[%c0_12, %c0_13] : memref<9x64xf32, #tpu.memory_space<vmem>>, vector<1x64xf32>
    %16 = vector.broadcast %15 : vector<1x64xf32> to vector<16x64xf32>
    %17 = arith.mulf %14, %16 : vector<16x64xf32>
    %18 = arith.addf %13, %17 : vector<16x64xf32>
    %c0_14 = arith.constant 0 : index
    %c4_15 = arith.constant 4 : index
    %19 = vector.load %arg8[%c0_14, %c4_15] : memref<18x72xf32, #tpu.memory_space<vmem>>, vector<16x64xf32>
    %c1_16 = arith.constant 1 : index
    %c0_17 = arith.constant 0 : index
    %20 = vector.load %arg4[%c1_16, %c0_17] : memref<9x64xf32, #tpu.memory_space<vmem>>, vector<1x64xf32>
    %21 = vector.broadcast %20 : vector<1x64xf32> to vector<16x64xf32>
    %22 = arith.mulf %19, %21 : vector<16x64xf32>
    %23 = arith.addf %18, %22 : vector<16x64xf32>
    %c0_18 = arith.constant 0 : index
    %c8 = arith.constant 8 : index
    %24 = vector.load %arg8[%c0_18, %c8] : memref<18x72xf32, #tpu.memory_space<vmem>>, vector<16x64xf32>
    %c2 = arith.constant 2 : index
    %c0_19 = arith.constant 0 : index
    %25 = vector.load %arg4[%c2, %c0_19] : memref<9x64xf32, #tpu.memory_space<vmem>>, vector<1x64xf32>
    %26 = vector.broadcast %25 : vector<1x64xf32> to vector<16x64xf32>
    %27 = arith.mulf %24, %26 : vector<16x64xf32>
    %28 = arith.addf %23, %27 : vector<16x64xf32>
    %c1_20 = arith.constant 1 : index
    %c0_21 = arith.constant 0 : index
    %29 = vector.load %arg8[%c1_20, %c0_21] : memref<18x72xf32, #tpu.memory_space<vmem>>, vector<16x64xf32>
    %c3 = arith.constant 3 : index
    %c0_22 = arith.constant 0 : index
    %30 = vector.load %arg4[%c3, %c0_22] : memref<9x64xf32, #tpu.memory_space<vmem>>, vector<1x64xf32>
    %31 = vector.broadcast %30 : vector<1x64xf32> to vector<16x64xf32>
    %32 = arith.mulf %29, %31 : vector<16x64xf32>
    %33 = arith.addf %28, %32 : vector<16x64xf32>
    %c1_23 = arith.constant 1 : index
    %c4_24 = arith.constant 4 : index
    %34 = vector.load %arg8[%c1_23, %c4_24] : memref<18x72xf32, #tpu.memory_space<vmem>>, vector<16x64xf32>
    %c4_25 = arith.constant 4 : index
    %c0_26 = arith.constant 0 : index
    %35 = vector.load %arg4[%c4_25, %c0_26] : memref<9x64xf32, #tpu.memory_space<vmem>>, vector<1x64xf32>
    %36 = vector.broadcast %35 : vector<1x64xf32> to vector<16x64xf32>
    %37 = arith.mulf %34, %36 : vector<16x64xf32>
    %38 = arith.addf %33, %37 : vector<16x64xf32>
    %c1_27 = arith.constant 1 : index
    %c8_28 = arith.constant 8 : index
    %39 = vector.load %arg8[%c1_27, %c8_28] : memref<18x72xf32, #tpu.memory_space<vmem>>, vector<16x64xf32>
    %c5 = arith.constant 5 : index
    %c0_29 = arith.constant 0 : index
    %40 = vector.load %arg4[%c5, %c0_29] : memref<9x64xf32, #tpu.memory_space<vmem>>, vector<1x64xf32>
    %41 = vector.broadcast %40 : vector<1x64xf32> to vector<16x64xf32>
    %42 = arith.mulf %39, %41 : vector<16x64xf32>
    %43 = arith.addf %38, %42 : vector<16x64xf32>
    %c2_30 = arith.constant 2 : index
    %c0_31 = arith.constant 0 : index
    %44 = vector.load %arg8[%c2_30, %c0_31] : memref<18x72xf32, #tpu.memory_space<vmem>>, vector<16x64xf32>
    %c6 = arith.constant 6 : index
    %c0_32 = arith.constant 0 : index
    %45 = vector.load %arg4[%c6, %c0_32] : memref<9x64xf32, #tpu.memory_space<vmem>>, vector<1x64xf32>
    %46 = vector.broadcast %45 : vector<1x64xf32> to vector<16x64xf32>
    %47 = arith.mulf %44, %46 : vector<16x64xf32>
    %48 = arith.addf %43, %47 : vector<16x64xf32>
    %c2_33 = arith.constant 2 : index
    %c4_34 = arith.constant 4 : index
    %49 = vector.load %arg8[%c2_33, %c4_34] : memref<18x72xf32, #tpu.memory_space<vmem>>, vector<16x64xf32>
    %c7 = arith.constant 7 : index
    %c0_35 = arith.constant 0 : index
    %50 = vector.load %arg4[%c7, %c0_35] : memref<9x64xf32, #tpu.memory_space<vmem>>, vector<1x64xf32>
    %51 = vector.broadcast %50 : vector<1x64xf32> to vector<16x64xf32>
    %52 = arith.mulf %49, %51 : vector<16x64xf32>
    %53 = arith.addf %48, %52 : vector<16x64xf32>
    %c2_36 = arith.constant 2 : index
    %c8_37 = arith.constant 8 : index
    %54 = vector.load %arg8[%c2_36, %c8_37] : memref<18x72xf32, #tpu.memory_space<vmem>>, vector<16x64xf32>
    %c8_38 = arith.constant 8 : index
    %c0_39 = arith.constant 0 : index
    %55 = vector.load %arg4[%c8_38, %c0_39] : memref<9x64xf32, #tpu.memory_space<vmem>>, vector<1x64xf32>
    %56 = vector.broadcast %55 : vector<1x64xf32> to vector<16x64xf32>
    %57 = arith.mulf %54, %56 : vector<16x64xf32>
    %58 = arith.addf %53, %57 : vector<16x64xf32>
    %c0_40 = arith.constant 0 : index
    %c0_41 = arith.constant 0 : index
    %59 = vector.load %arg5[%c0_40, %c0_41] : memref<64x128xf32, #tpu.memory_space<vmem>>, vector<64x128xf32>
    %cst_42 = arith.constant dense<0.000000e+00> : vector<16x128xf32>
    %60 = tpu.matmul %58, %59, %cst_42 {dimension_numbers = #tpu.dot_dimension_numbers<[1], [0], [0], [1], [0, 0, 1, 1], [], []>} : vector<16x64xf32>, vector<64x128xf32>, vector<16x128xf32> -> vector<16x128xf32>
    %61 = vector.shape_cast %60 : vector<16x128xf32> to vector<1x16x128xf32>
    %c0_43 = arith.constant 0 : index
    %c0_44 = arith.constant 0 : index
    %c0_45 = arith.constant 0 : index
    %62 = vector.load %arg6[%c0_43, %c0_44, %c0_45] : memref<1x16x128xf32, #tpu.memory_space<vmem>>, vector<1x16x128xf32>
    tpu.vector_store %arg6[%c0_43, %c0_44, %c0_45], %61 {strides = array<i32>} : memref<1x16x128xf32, #tpu.memory_space<vmem>>, vector<1x16x128xf32>,
    %cst_46 = arith.constant dense<0.000000e+00> : vector<128xf32>
    %63 = vector.multi_reduction <add>, %60, %cst_46 [0] : vector<16x128xf32> to vector<128xf32>
    %64 = vector.shape_cast %63 : vector<128xf32> to vector<1x128xf32>
    %65 = arith.mulf %60, %60 : vector<16x128xf32>
    %cst_47 = arith.constant dense<0.000000e+00> : vector<128xf32>
    %66 = vector.multi_reduction <add>, %65, %cst_47 [0] : vector<16x128xf32> to vector<128xf32>
    %67 = vector.shape_cast %66 : vector<128xf32> to vector<1x128xf32>
    %68 = tpu.concatenate %64, %67 in 0 : vector<1x128xf32>, vector<1x128xf32> -> vector<2x128xf32>
    %69 = vector.shape_cast %68 : vector<2x128xf32> to vector<1x2x128xf32>
    %c0_48 = arith.constant 0 : index
    %c0_49 = arith.constant 0 : index
    %c0_50 = arith.constant 0 : index
    %70 = vector.load %arg7[%c0_48, %c0_49, %c0_50] : memref<1x2x128xf32, #tpu.memory_space<vmem>>, vector<1x2x128xf32>
    tpu.vector_store %arg7[%c0_48, %c0_49, %c0_50], %69 {strides = array<i32>} : memref<1x2x128xf32, #tpu.memory_space<vmem>>, vector<1x2x128xf32>,
    return
  }
  func.func @transform_0(%arg0: i32) -> (i32, i32, i32) {
    %c0_i32 = arith.constant 0 : i32
    %c0_i32_0 = arith.constant 0 : i32
    %c0_i32_1 = arith.constant 0 : i32
    return %arg0, %c0_i32, %c0_i32_0 : i32, i32, i32
  }
  func.func @transform_1(%arg0: i32) -> (i32, i32) {
    %c0_i32 = arith.constant 0 : i32
    %c0_i32_0 = arith.constant 0 : i32
    %c0_i32_1 = arith.constant 0 : i32
    return %c0_i32, %c0_i32_0 : i32, i32
  }
  func.func @transform_2(%arg0: i32) -> (i32, i32) {
    %c0_i32 = arith.constant 0 : i32
    %c0_i32_0 = arith.constant 0 : i32
    %c0_i32_1 = arith.constant 0 : i32
    return %c0_i32, %c0_i32_0 : i32, i32
  }
  func.func @transform_3(%arg0: i32) -> (i32, i32) {
    %c0_i32 = arith.constant 0 : i32
    %c0_i32_0 = arith.constant 0 : i32
    %c0_i32_1 = arith.constant 0 : i32
    return %c0_i32, %c0_i32_0 : i32, i32
  }
  func.func @transform_4(%arg0: i32) -> (i32, i32) {
    %c0_i32 = arith.constant 0 : i32
    %c0_i32_0 = arith.constant 0 : i32
    %c0_i32_1 = arith.constant 0 : i32
    return %c0_i32, %c0_i32_0 : i32, i32
  }
  func.func @transform_5(%arg0: i32) -> (i32, i32, i32) {
    %c0_i32 = arith.constant 0 : i32
    %c0_i32_0 = arith.constant 0 : i32
    %c0_i32_1 = arith.constant 0 : i32
    return %arg0, %c0_i32, %c0_i32_0 : i32, i32, i32
  }
  func.func @transform_6(%arg0: i32) -> (i32, i32, i32) {
    %c0_i32 = arith.constant 0 : i32
    %c0_i32_0 = arith.constant 0 : i32
    %c0_i32_1 = arith.constant 0 : i32
    return %arg0, %c0_i32, %c0_i32_0 : i32, i32, i32
  }
}

module attributes {stable_mosaic.version = 11 : i64} {
  func.func @_bn_apply_kernel(%arg0: i32, %arg1: memref<32x128xf32, #tpu.memory_space<vmem>>, %arg2: memref<1x128xf32, #tpu.memory_space<vmem>>, %arg3: memref<1x128xf32, #tpu.memory_space<vmem>>, %arg4: memref<32x128xf32, #tpu.memory_space<vmem>>) attributes {dimension_semantics = [#tpu.dimension_semantics<parallel>], iteration_bounds = array<i64: 1>, scalar_prefetch = 0 : i64, scratch_operands = 0 : i64, tpu.core_type = #tpu.core_type<tc>, window_params = [{pipeline_mode = #tpu.pipeline_mode<synchronous>, transform_indices = @transform_0, window_bounds = array<i64: 32, 128>}, {pipeline_mode = #tpu.pipeline_mode<synchronous>, transform_indices = @transform_1, window_bounds = array<i64: 1, 128>}, {pipeline_mode = #tpu.pipeline_mode<synchronous>, transform_indices = @transform_2, window_bounds = array<i64: 1, 128>}, {pipeline_mode = #tpu.pipeline_mode<synchronous>, transform_indices = @transform_3, window_bounds = array<i64: 32, 128>}]} {
    %c0 = arith.constant 0 : index
    %c0_0 = arith.constant 0 : index
    %0 = vector.load %arg1[%c0, %c0_0] : memref<32x128xf32, #tpu.memory_space<vmem>>, vector<32x128xf32>
    %c0_1 = arith.constant 0 : index
    %c0_2 = arith.constant 0 : index
    %1 = vector.load %arg2[%c0_1, %c0_2] : memref<1x128xf32, #tpu.memory_space<vmem>>, vector<1x128xf32>
    %2 = vector.broadcast %1 : vector<1x128xf32> to vector<32x128xf32>
    %3 = arith.mulf %0, %2 : vector<32x128xf32>
    %c0_3 = arith.constant 0 : index
    %c0_4 = arith.constant 0 : index
    %4 = vector.load %arg3[%c0_3, %c0_4] : memref<1x128xf32, #tpu.memory_space<vmem>>, vector<1x128xf32>
    %5 = vector.broadcast %4 : vector<1x128xf32> to vector<32x128xf32>
    %6 = arith.addf %3, %5 : vector<32x128xf32>
    %c0_5 = arith.constant 0 : index
    %c0_6 = arith.constant 0 : index
    %7 = vector.load %arg4[%c0_5, %c0_6] : memref<32x128xf32, #tpu.memory_space<vmem>>, vector<32x128xf32>
    tpu.vector_store %arg4[%c0_5, %c0_6], %6 {strides = array<i32>} : memref<32x128xf32, #tpu.memory_space<vmem>>, vector<32x128xf32>,
    return
  }
  func.func @transform_0(%arg0: i32) -> (i32, i32) {
    %c0_i32 = arith.constant 0 : i32
    %c0_i32_0 = arith.constant 0 : i32
    %c0_i32_1 = arith.constant 0 : i32
    return %c0_i32, %c0_i32_0 : i32, i32
  }
  func.func @transform_1(%arg0: i32) -> (i32, i32) {
    %c0_i32 = arith.constant 0 : i32
    %c0_i32_0 = arith.constant 0 : i32
    %c0_i32_1 = arith.constant 0 : i32
    return %c0_i32, %c0_i32_0 : i32, i32
  }
  func.func @transform_2(%arg0: i32) -> (i32, i32) {
    %c0_i32 = arith.constant 0 : i32
    %c0_i32_0 = arith.constant 0 : i32
    %c0_i32_1 = arith.constant 0 : i32
    return %c0_i32, %c0_i32_0 : i32, i32
  }
  func.func @transform_3(%arg0: i32) -> (i32, i32) {
    %c0_i32 = arith.constant 0 : i32
    %c0_i32_0 = arith.constant 0 : i32
    %c0_i32_1 = arith.constant 0 : i32
    return %c0_i32, %c0_i32_0 : i32, i32
  }
}

</mosaic_0001>

<bundles_post_ra>
// kernel: tile.39
= control target key start
LH: loop header
LB: loop body
LE: loop exit
PB: predicated region body
PF: predicated region fallthrough
CT: control target
= control target key end

     0   :  { %s28_s0 = inlined_call_operand.vmem [shape: f32[4], index: 0, kind: input, shape index: {}]   ;;  %s29_s1 = inlined_call_operand.vmem [shape: f32[16,4], index: 1, kind: output, shape index: {}]  }
   0x1   :  { %v4_v0 = vld [vmem:[%s28_s0] ss:$0 sm:$0xff] }
   0x2   :  { %5 = vst [vmem:[%s29_s1] sm:$0xff] %v4_v0  ;;  %8 = vst [vmem:[%s29_s1 + $0x8] sm:$0xff] %v4_v0 }

// kernel: tile.40
= control target key start
LH: loop header
LB: loop body
LE: loop exit
PB: predicated region body
PF: predicated region fallthrough
CT: control target
= control target key end

     0   :  { %s131_s10 = smov 60   ;;  %s132_s11 = smov 52   ;;  %vm3_vm0 = vcmask 31744   ;;  %vm9_vm1 = vcmask 523744   ;;  %vm15_vm2 = vcmask 490944   ;;  %vm21_vm3 = vcmask 458144   ;;  %s207_s0 = inlined_call_operand.vmem [shape: f32[16,4], index: 0, kind: input, shape index: {}]   ;;  %s208_s1 = inlined_call_operand.vmem [shape: f32[1,64], index: 1, kind: output, shape index: {}]  }
   0x1   :  { %v101_v0 = vld [vmem:[%s207_s0 + $0xf] sm:$0x1]   ;;  %v103_v1 = vld [vmem:[%s207_s0 + $0xd] sm:$0x1]   ;;  %v102_v2 = vld [vmem:[%s207_s0 + $0xe] sm:$0x1]  }
   0x2   :  { %7 = vrot.lane.b32.xlu0 %v101_v0, %s131_s10  ;;  %19 = vrot.lane.b32.xlu1 %v103_v1, %s132_s11  ;;  %v104_v3 = vld [vmem:[%s207_s0 + $0xc] sm:$0x1]   ;;  %s133_s16 = smov 56   ;;  %s134_s17 = smov 48   ;;  %v105_v4 = vld [vmem:[%s207_s0 + $0xb] sm:$0x1]  }
   0x3   :  { %v106_v5 = vld [vmem:[%s207_s0 + $0xa] sm:$0x1]   ;;  %v2_v6 = vld [vmem:[%s207_s0] sm:$0x1]   ;;  %s135_s24 = smov 44   ;;  %s136_s25 = smov 40  }
   0x4   :  { %4 = vst.msk [vmem:[#allocation0] sm:$0x1] %vm3_vm0, %v2_v6   ;;  %v107_v7 = vld [vmem:[%s207_s0 + $0x9] sm:$0x1]   ;;  %v108_v8 = vld [vmem:[%s207_s0 + $0x8] sm:$0x1]  }
   0x5   :  { %s137_s30 = smov 36   ;;  %s138_s2 = smov 32   ;;  %v109_v9 = vld [vmem:[%s207_s0 + $0x7] sm:$0x1]   ;;  %v110_v10 = vld [vmem:[%s207_s0 + $0x6] sm:$0x1]  }
   0x6   :  { %13 = vrot.lane.b32.xlu0 %v102_v2, %s133_s16  ;;  %25 = vrot.lane.b32.xlu1 %v104_v3, %s134_s17  ;;  %s139_s7 = smov 28   ;;  %s140_s8 = smov 24   ;;  %v111_v11 = vld [vmem:[%s207_s0 + $0x5] sm:$0x1]   ;;  %v112_v12 = vld [vmem:[%s207_s0 + $0x4] sm:$0x1]  }
   0x7   :  { %s141_s13 = smov 20   ;;  %s142_s14 = smov 16   ;;  %v113_v13 = vld [vmem:[%s207_s0 + $0x3] sm:$0x1]   ;;  %v114_v14 = vld [vmem:[%s207_s0 + $0x2] sm:$0x1]  }
   0x8   :  { %s143_s19 = smov 12   ;;  %s144_s20 = smov 8   ;;  %v115_v15 = vld [vmem:[%s207_s0 + $0x1] sm:$0x1]   ;;  %vm27_vm4 = vcmask 425344   ;;  %vm33_vm5 = vcmask 392544  }
   0x9   :  { %s145_s0 = smov 4   ;;  %vm39_vm6 = vcmask 359744   ;;  %vm45_vm7 = vcmask 326944   ;;  %vm51_vm8 = vcmask 294144   ;;  %vm57_vm9 = vcmask 261344  }
   0xa   :  { %31 = vrot.lane.b32.xlu0 %v105_v4, %s135_s24  ;;  %37 = vrot.lane.b32.xlu1 %v106_v5, %s136_s25  ;;  %vm63_vm10 = vcmask 228544   ;;  %vm69_vm11 = vcmask 195744   ;;  %vm75_vm12 = vcmask 162944   ;;  %vm81_vm13 = vcmask 130144  }
   0xb   :  { %vm87_vm14 = vcmask 97344   ;;  %vm93_vm15 = vcmask 64544  }
   0xe   :  { %43 = vrot.lane.b32.xlu0 %v107_v7, %s137_s30  ;;  %49 = vrot.lane.b32.xlu1 %v108_v8, %s138_s2 }
  0x12   :  { %55 = vrot.lane.b32.xlu0 %v109_v9, %s139_s7  ;;  %61 = vrot.lane.b32.xlu1 %v110_v10, %s140_s8 }
  0x16   :  { %67 = vrot.lane.b32.xlu0 %v111_v11, %s141_s13  ;;  %73 = vrot.lane.b32.xlu1 %v112_v12, %s142_s14 }
  0x1a   :  { %79 = vrot.lane.b32.xlu0 %v113_v13, %s143_s19  ;;  %85 = vrot.lane.b32.xlu1 %v114_v14, %s144_s20 }
  0x1e   :  { %91 = vrot.lane.b32.xlu0 %v115_v15, %s145_s0 }
  0x74   :  { %v8_v16 = vpop.permute.xlu0 %7   ;;  %v20_v17 = vpop.permute.xlu1 %19  }
  0x75   :  { %10 = vst.msk [vmem:[#allocation0] sm:$0x1] %vm9_vm1, %v8_v16  }
  0x78   :  { %v14_v18 = vpop.permute.xlu0 %13   ;;  %v26_v19 = vpop.permute.xlu1 %25  }
  0x79   :  { %16 = vst.msk [vmem:[#allocation0] sm:$0x1] %vm15_vm2, %v14_v18  }
  0x7a   :  { %22 = vst.msk [vmem:[#allocation0] sm:$0x1] %vm21_vm3, %v20_v17  }
  0x7b   :  { %28 = vst.msk [vmem:[#allocation0] sm:$0x1] %vm27_vm4, %v26_v19  }
  0x7c   :  { %v32_v20 = vpop.permute.xlu0 %31   ;;  %v38_v21 = vpop.permute.xlu1 %37  }
  0x7d   :  { %34 = vst.msk [vmem:[#allocation0] sm:$0x1] %vm33_vm5, %v32_v20  }
  0x7e   :  { %40 = vst.msk [vmem:[#allocation0] sm:$0x1] %vm39_vm6, %v38_v21  }
  0x80   :  { %v44_v22 = vpop.permute.xlu0 %43   ;;  %v50_v23 = vpop.permute.xlu1 %49  }
  0x81   :  { %46 = vst.msk [vmem:[#allocation0] sm:$0x1] %vm45_vm7, %v44_v22  }
  0x82   :  { %52 = vst.msk [vmem:[#allocation0] sm:$0x1] %vm51_vm8, %v50_v23  }
  0x84   :  { %v56_v24 = vpop.permute.xlu0 %55   ;;  %v62_v25 = vpop.permute.xlu1 %61  }
  0x85   :  { %58 = vst.msk [vmem:[#allocation0] sm:$0x1] %vm57_vm9, %v56_v24  }
  0x86   :  { %64 = vst.msk [vmem:[#allocation0] sm:$0x1] %vm63_vm10, %v62_v25  }
  0x88   :  { %v68_v26 = vpop.permute.xlu0 %67   ;;  %v74_v27 = vpop.permute.xlu1 %73  }
  0x89   :  { %70 = vst.msk [vmem:[#allocation0] sm:$0x1] %vm69_vm11, %v68_v26  }
  0x8a   :  { %76 = vst.msk [vmem:[#allocation0] sm:$0x1] %vm75_vm12, %v74_v27  }
  0x8c   :  { %v80_v28 = vpop.permute.xlu0 %79   ;;  %v86_v29 = vpop.permute.xlu1 %85  }
  0x8d   :  { %82 = vst.msk [vmem:[#allocation0] sm:$0x1] %vm81_vm13, %v80_v28  }
  0x8e   :  { %88 = vst.msk [vmem:[#allocation0] sm:$0x1] %vm87_vm14, %v86_v29  }
  0x90   :  { %v92_v30 = vpop.permute.xlu0 %91  }
  0x91   :  { %94 = vst.msk [vmem:[#allocation0] sm:$0x1] %vm93_vm15, %v92_v30  }
  0x98   :  { %v98_v31 = vld [vmem:[#allocation0] sm:$0x1] }
  0x99   :  { %100 = vst [vmem:[%s208_s1] sm:$0x1] %v98_v31 }

// kernel: tile.49
= control target key start
LH: loop header
LB: loop body
LE: loop exit
PB: predicated region body
PF: predicated region fallthrough
CT: control target
= control target key end

     0   :  { %s28_s0 = inlined_call_operand.vmem [shape: f32[8], index: 0, kind: input, shape index: {}]   ;;  %s29_s1 = inlined_call_operand.vmem [shape: f32[16,8], index: 1, kind: output, shape index: {}]  }
   0x1   :  { %v4_v0 = vld [vmem:[%s28_s0] ss:$0 sm:$0xff] }
   0x2   :  { %5 = vst [vmem:[%s29_s1] sm:$0xff] %v4_v0  ;;  %8 = vst [vmem:[%s29_s1 + $0x8] sm:$0xff] %v4_v0 }

// kernel: tile.50
= control target key start
LH: loop header
LB: loop body
LE: loop exit
PB: predicated region body
PF: predicated region fallthrough
CT: control target
= control target key end

     0   :  { %s131_s10 = smov 120   ;;  %s132_s11 = smov 104   ;;  %vm3_vm0 = vcmask 64512   ;;  %vm9_vm1 = vcmask 1048512   ;;  %vm15_vm2 = vcmask 982912   ;;  %vm21_vm3 = vcmask 917312   ;;  %s207_s0 = inlined_call_operand.vmem [shape: f32[16,8], index: 0, kind: input, shape index: {}]   ;;  %s208_s1 = inlined_call_operand.vmem [shape: f32[1,128], index: 1, kind: output, shape index: {}]  }
   0x1   :  { %v101_v0 = vld [vmem:[%s207_s0 + $0xf] sm:$0x1]   ;;  %v103_v1 = vld [vmem:[%s207_s0 + $0xd] sm:$0x1]   ;;  %v102_v2 = vld [vmem:[%s207_s0 + $0xe] sm:$0x1]  }
   0x2   :  { %7 = vrot.lane.b32.xlu0 %v101_v0, %s131_s10  ;;  %19 = vrot.lane.b32.xlu1 %v103_v1, %s132_s11  ;;  %v104_v3 = vld [vmem:[%s207_s0 + $0xc] sm:$0x1]   ;;  %s133_s16 = smov 112   ;;  %s134_s17 = smov 96   ;;  %v105_v4 = vld [vmem:[%s207_s0 + $0xb] sm:$0x1]  }
   0x3   :  { %v106_v5 = vld [vmem:[%s207_s0 + $0xa] sm:$0x1]   ;;  %v2_v6 = vld [vmem:[%s207_s0] sm:$0x1]   ;;  %s135_s24 = smov 88   ;;  %s136_s25 = smov 80  }
   0x4   :  { %4 = vst.msk [vmem:[#allocation0] sm:$0x1] %vm3_vm0, %v2_v6   ;;  %v107_v7 = vld [vmem:[%s207_s0 + $0x9] sm:$0x1]   ;;  %v108_v8 = vld [vmem:[%s207_s0 + $0x8] sm:$0x1]  }
   0x5   :  { %s137_s30 = smov 72   ;;  %s138_s2 = smov 64   ;;  %v109_v9 = vld [vmem:[%s207_s0 + $0x7] sm:$0x1]   ;;  %v110_v10 = vld [vmem:[%s207_s0 + $0x6] sm:$0x1]  }
   0x6   :  { %13 = vrot.lane.b32.xlu0 %v102_v2, %s133_s16  ;;  %25 = vrot.lane.b32.xlu1 %v104_v3, %s134_s17  ;;  %s139_s7 = smov 56   ;;  %s140_s8 = smov 48   ;;  %v111_v11 = vld [vmem:[%s207_s0 + $0x5] sm:$0x1]   ;;  %v112_v12 = vld [vmem:[%s207_s0 + $0x4] sm:$0x1]  }
   0x7   :  { %s141_s13 = smov 40   ;;  %s142_s14 = smov 32   ;;  %v113_v13 = vld [vmem:[%s207_s0 + $0x3] sm:$0x1]   ;;  %v114_v14 = vld [vmem:[%s207_s0 + $0x2] sm:$0x1]  }
   0x8   :  { %s143_s19 = smov 24   ;;  %s144_s20 = smov 16   ;;  %v115_v15 = vld [vmem:[%s207_s0 + $0x1] sm:$0x1]   ;;  %vm27_vm4 = vcmask 851712   ;;  %vm33_vm5 = vcmask 786112  }
   0x9   :  { %s145_s0 = smov 8   ;;  %vm39_vm6 = vcmask 720512   ;;  %vm45_vm7 = vcmask 654912   ;;  %vm51_vm8 = vcmask 589312   ;;  %vm57_vm9 = vcmask 523712  }
   0xa   :  { %31 = vrot.lane.b32.xlu0 %v105_v4, %s135_s24  ;;  %37 = vrot.lane.b32.xlu1 %v106_v5, %s136_s25  ;;  %vm63_vm10 = vcmask 458112   ;;  %vm69_vm11 = vcmask 392512   ;;  %vm75_vm12 = vcmask 326912   ;;  %vm81_vm13 = vcmask 261312  }
   0xb   :  { %vm87_vm14 = vcmask 195712   ;;  %vm93_vm15 = vcmask 130112  }
   0xe   :  { %43 = vrot.lane.b32.xlu0 %v107_v7, %s137_s30  ;;  %49 = vrot.lane.b32.xlu1 %v108_v8, %s138_s2 }
  0x12   :  { %55 = vrot.lane.b32.xlu0 %v109_v9, %s139_s7  ;;  %61 = vrot.lane.b32.xlu1 %v110_v10, %s140_s8 }
  0x16   :  { %67 = vrot.lane.b32.xlu0 %v111_v11, %s141_s13  ;;  %73 = vrot.lane.b32.xlu1 %v112_v12, %s142_s14 }
  0x1a   :  { %79 = vrot.lane.b32.xlu0 %v113_v13, %s143_s19  ;;  %85 = vrot.lane.b32.xlu1 %v114_v14, %s144_s20 }
  0x1e   :  { %91 = vrot.lane.b32.xlu0 %v115_v15, %s145_s0 }
  0x74   :  { %v8_v16 = vpop.permute.xlu0 %7   ;;  %v20_v17 = vpop.permute.xlu1 %19  }
  0x75   :  { %10 = vst.msk [vmem:[#allocation0] sm:$0x1] %vm9_vm1, %v8_v16  }
  0x78   :  { %v14_v18 = vpop.permute.xlu0 %13   ;;  %v26_v19 = vpop.permute.xlu1 %25  }
  0x79   :  { %16 = vst.msk [vmem:[#allocation0] sm:$0x1] %vm15_vm2, %v14_v18  }
  0x7a   :  { %22 = vst.msk [vmem:[#allocation0] sm:$0x1] %vm21_vm3, %v20_v17  }
  0x7b   :  { %28 = vst.msk [vmem:[#allocation0] sm:$0x1] %vm27_vm4, %v26_v19  }
  0x7c   :  { %v32_v20 = vpop.permute.xlu0 %31   ;;  %v38_v21 = vpop.permute.xlu1 %37  }
  0x7d   :  { %34 = vst.msk [vmem:[#allocation0] sm:$0x1] %vm33_vm5, %v32_v20  }
  0x7e   :  { %40 = vst.msk [vmem:[#allocation0] sm:$0x1] %vm39_vm6, %v38_v21  }
  0x80   :  { %v44_v22 = vpop.permute.xlu0 %43   ;;  %v50_v23 = vpop.permute.xlu1 %49  }
  0x81   :  { %46 = vst.msk [vmem:[#allocation0] sm:$0x1] %vm45_vm7, %v44_v22  }
  0x82   :  { %52 = vst.msk [vmem:[#allocation0] sm:$0x1] %vm51_vm8, %v50_v23  }
  0x84   :  { %v56_v24 = vpop.permute.xlu0 %55   ;;  %v62_v25 = vpop.permute.xlu1 %61  }
  0x85   :  { %58 = vst.msk [vmem:[#allocation0] sm:$0x1] %vm57_vm9, %v56_v24  }
  0x86   :  { %64 = vst.msk [vmem:[#allocation0] sm:$0x1] %vm63_vm10, %v62_v25  }
  0x88   :  { %v68_v26 = vpop.permute.xlu0 %67   ;;  %v74_v27 = vpop.permute.xlu1 %73  }
  0x89   :  { %70 = vst.msk [vmem:[#allocation0] sm:$0x1] %vm69_vm11, %v68_v26  }
  0x8a   :  { %76 = vst.msk [vmem:[#allocation0] sm:$0x1] %vm75_vm12, %v74_v27  }
  0x8c   :  { %v80_v28 = vpop.permute.xlu0 %79   ;;  %v86_v29 = vpop.permute.xlu1 %85  }
  0x8d   :  { %82 = vst.msk [vmem:[#allocation0] sm:$0x1] %vm81_vm13, %v80_v28  }
  0x8e   :  { %88 = vst.msk [vmem:[#allocation0] sm:$0x1] %vm87_vm14, %v86_v29  }
  0x90   :  { %v92_v30 = vpop.permute.xlu0 %91  }
  0x91   :  { %94 = vst.msk [vmem:[#allocation0] sm:$0x1] %vm93_vm15, %v92_v30  }
  0x98   :  { %v98_v31 = vld [vmem:[#allocation0] sm:$0x1] }
  0x99   :  { %100 = vst [vmem:[%s208_s1] sm:$0x1] %v98_v31 }

// kernel: sepconv_forward.3
= control target key start
LH: loop header
LB: loop body
LE: loop exit
PB: predicated region body
PF: predicated region fallthrough
CT: control target
= control target key end

     0   :  { %s795_s21 = smov 0   ;;  %s905_s0 = inlined_call_operand.vmem [shape: f32[2,16,64], index: 0, kind: input, shape index: {}]   ;;  %s906_s1 = inlined_call_operand.vmem [shape: f32[1,64], index: 1, kind: input, shape index: {}]   ;;  %s907_s2 = inlined_call_operand.vmem [shape: f32[1,64], index: 2, kind: input, shape index: {}]   ;;  %s908_s3 = inlined_call_operand.vmem [shape: f32[9,64], index: 3, kind: input, shape index: {}]   ;;  %s909_s4 = inlined_call_operand.vmem [shape: f32[64,64], index: 4, kind: input, shape index: {}]   ;;  %s910_s5 = inlined_call_operand.vmem [shape: f32[2,16,64], index: 5, kind: output, shape index: {0}]   ;;  %s911_s6 = inlined_call_operand.vmem [shape: f32[2,2,64], index: 6, kind: output, shape index: {1}]  }
   0x1 LB: > { %s662_s22 = sadd.s32 4294967295, %s753_s21   ;;  %p666_p0 = scmp.ge.s32.totalorder %s753_s21, 1  ;;  %s753_s21 = sphi %s795_s21, %s17_s21  }
   0x2   : > { %p215_p1 = scmp.lt.s32.totalorder %s753_s21, 3 }
   0x4   : > { %p216_p2 = pnand %p666_p0, %p215_p1 }
   0x5   : > { %v675_v0 = vld [vmem:[%s908_s3 + $0x1] ss:$0 sm:$0xff] (!%p216_p2)  ;;  %p249_p3 = scmp.lt.s32.totalorder (!%p216_p2), %s662_s22, 1  ;;  %s755_s25 = smov (!%p216_p2), 4   ;;  %vm285_vm0 = vcmask (!%p216_p2), 588800   ;;  %v756_v2 = vmov (!%p216_p2), 0.0  }
   0x6   : > { %219 = sbr.rel (%p216_p2) target bundleno = 521 (0x209), region = 40  ;;  %318 = vrot.lane.b32.xlu1 (!%p216_p2), %v675_v0, %s755_s25  ;;  %v676_v1 = vld [vmem:[%s908_s3 + $0x2] ss:$0 sm:$0xff] (!%p216_p2)  ;;  %286 = vst.msk [vmem:[#allocation2] sm:$0xff] (!%p216_p2), %vm285_vm0, %v756_v2  ;;  %287 = vst.msk [vmem:[#allocation2 + $0x8] sm:$0xff] (!%p216_p2), %vm285_vm0, %v756_v2  ;;  %vm288_vm1 = vcmask (!%p216_p2), 582656  }
   0x7   : > { %v672_v3 = vld [vmem:[%s906_s1] ss:$0 sm:$0xff] (!%p216_p2)  ;;  %289 = vst.msk [vmem:[#allocation2 + $0x10] sm:$0x3] (!%p216_p2), %vm288_vm1, %v756_v2  ;;  %s757_s12 = smov (!%p216_p2), 8   ;;  %vm298_vm2 = vcmask (!%p216_p2), 556064  }
   0x8   : > { %v673_v4 = vld [vmem:[%s907_s2] ss:$0 sm:$0xff] (!%p216_p2)  ;;  %v679_v7 = vld [vmem:[%s908_s3 + $0x5] ss:$0 sm:$0xff] (!%p216_p2)  ;;  %v682_v12 = vld [vmem:[%s908_s3 + $0x8] ss:$0 sm:$0xff] (!%p216_p2) }
   0x9   : > { %v678_v15 = vld [vmem:[%s908_s3 + $0x4] ss:$0 sm:$0xff] (!%p216_p2)  ;;  %v681_v16 = vld [vmem:[%s908_s3 + $0x7] ss:$0 sm:$0xff] (!%p216_p2)  ;;  %v461_v21 = vld [vmem:[%s909_s4 + $0x8] sm:$0xff] (!%p216_p2)  ;;  %s758_s29 = smov (!%p216_p2), 124  }
   0xa   : > { %339 = vrot.lane.b32.xlu1 (!%p216_p2), %v676_v1, %s757_s12  ;;  %v460_v20 = vld [vmem:[%s909_s4] sm:$0xff] (!%p216_p2)  ;;  %v462_v25 = vld [vmem:[%s909_s4 + $0x10] sm:$0xff] (!%p216_p2)  ;;  %v463_v26 = vld [vmem:[%s909_s4 + $0x18] sm:$0xff] (!%p216_p2)  ;;  %vm468_vm3 = vcmask (!%p216_p2), 523264   ;;  %vm572_vm4 = vcmask (!%p216_p2), 1040384   ;;  %vm574_vm5 = vcmask (!%p216_p2), 517120  }
   0xb   : > { %v718_v23 = vpack.c.bf16 (!%p216_p2), %v461_v21, %v460_v20  ;;  %v722_v28 = vpack.c.bf16 (!%p216_p2), %v463_v26, %v462_v25  ;;  %v464_v34 = vld [vmem:[%s909_s4 + $0x20] sm:$0xff] (!%p216_p2)  ;;  %v465_v35 = vld [vmem:[%s909_s4 + $0x28] sm:$0xff] (!%p216_p2)  ;;  %v466_v41 = vld [vmem:[%s909_s4 + $0x30] sm:$0xff] (!%p216_p2) }
   0xc   : > { %v726_v36 = vpack.c.bf16 (!%p216_p2), %v465_v35, %v464_v34  ;;  %v467_v42 = vld [vmem:[%s909_s4 + $0x38] sm:$0xff] (!%p216_p2)  ;;  %v674_v55 = vld [vmem:[%s908_s3] ss:$0 sm:$0xff] (!%p216_p2)  ;;  %v677_v58 = vld [vmem:[%s908_s3 + $0x3] ss:$0 sm:$0xff] (!%p216_p2) }
   0xd   : > { %s913_s22 = smov (!%p249_p3, %s662_s22), 1  ;;  %719 = vmatprep.subr.bf16.mxu0 %v718_v23  ;;  %v730_v43 = vpack.c.bf16 %v467_v42, %v466_v41 }
   0xe   : > { %s687_s28 = sshll.u32 %s913_s22, 4  ;;  %392 = vrot.lane.b32.xlu1 %v679_v7, %s757_s12  ;;  %721 = vmatpush3.bf16.msra.mxu0 %v718_v23  ;;  %v680_v7 = vld [vmem:[%s908_s3 + $0x6] ss:$0 sm:$0xff] }
   0xf   : > { %s253_s9 = scalar_lea.vmem %s905_s0, %s687_s28  ;;  %723 = vmatprep.subr.bf16.mxu0 %v722_v28 }
  0x10   : > { %v263_v5 = vld [vmem:[%s253_s9] sm:$0xff]  ;;  %v264_v6 = vld [vmem:[%s253_s9 + $0x8] sm:$0xff]  ;;  %s759_s9 = smov 120  }
  0x11   : > { %v272_v8 = vmul.f32 %v672_v3, %v263_v5  ;;  %v273_v9 = vmul.f32 %v672_v3, %v264_v6 }
  0x12   : > { %445 = vrot.lane.b32.xlu1 %v682_v12, %s757_s12  ;;  %725 = vmatpush3.bf16.msra.mxu0 %v722_v28 }
  0x13   : > { %v281_v10 = vadd.f32 %v673_v4, %v272_v8  ;;  %v282_v11 = vadd.f32 %v673_v4, %v273_v9  ;;  %727 = vmatprep.subr.bf16.mxu0 %v726_v36 }
  0x15   : > { %v283_v13 = vmax.f32 %v281_v10, 0.0  ;;  %v284_v14 = vmax.f32 %v282_v11, 0.0 }
  0x16   : > { %729 = vmatpush3.bf16.msra.mxu0 %v726_v36 }
  0x17   : > { %292 = vrot.lane.b32.xlu0 %v283_v13, %s755_s25  ;;  %731 = vmatprep.subr.bf16.mxu0 %v730_v43 }
  0x1a   : > { %733 = vmatpush3.bf16.msra.mxu0 %v730_v43 }
  0x1b   : > { %294 = vrot.lane.b32.xlu0 %v284_v14, %s755_s25 }
  0x1f   : > { %371 = vrot.lane.b32.xlu0 %v678_v15, %s755_s25 }
  0x23   : > { %424 = vrot.lane.b32.xlu0 %v681_v16, %s755_s25  ;;  %s258_s25 = scalar_lea.vmem %s910_s5, %s687_s28  ;;  %s671_s28 = sshll.u32 %s913_s22, 1 }
  0x24   : > { %s262_s8 = scalar_lea.vmem %s911_s6, %s671_s28 }
  0x78   : > { %v319_v19 = vpop.permute.xlu1 %318 }
  0x7c   : > { %v340_v27 = vpop.permute.xlu1 %339 }
  0x80   : > { %v393_v38 = vpop.permute.xlu1 %392 }
  0x84   : > { %v446_v50 = vpop.permute.xlu1 %445 }
  0x89   : > { %v293_v17 = vpop.permute.xlu0 %292 }
  0x8a   : > { %299 = vst.msk [vmem:[#allocation2 + $0x1] sm:$0xff] %vm298_vm2, %v293_v17 }
  0x8d   : > { %v295_v18 = vpop.permute.xlu0 %294 }
  0x8e   : > { %300 = vst.msk [vmem:[#allocation2 + $0x9] sm:$0xff] %vm298_vm2, %v295_v18 }
  0x91   : > { %v301_v22 = vld [vmem:[#allocation2] sm:$0xff]  ;;  %v372_v32 = vpop.permute.xlu0 %371 }
  0x92   : > { %v321_v24 = vmul.f32 %v319_v19, %v301_v22  ;;  %v342_v29 = vmul.f32 %v340_v27, %v301_v22  ;;  %v354_v31 = vld [vmem:[#allocation2 + $0x1] sm:$0xff]  ;;  %v308_v57 = vmul.f32 %v674_v55, %v301_v22 }
  0x93   : > { %v374_v37 = vmul.f32 %v372_v32, %v354_v31  ;;  %v395_v44 = vmul.f32 %v393_v38, %v354_v31  ;;  %v361_v63 = vmul.f32 %v677_v58, %v354_v31 }
  0x94   : > { %325 = vrot.lane.b32.xlu0 %v321_v24, %s758_s29 }
  0x95   : > { %v302_v30 = vld [vmem:[#allocation2 + $0x8] sm:$0xff]  ;;  %v425_v47 = vpop.permute.xlu0 %424 }
  0x96   : > { %v322_v33 = vmul.f32 %v319_v19, %v302_v30  ;;  %v343_v39 = vmul.f32 %v340_v27, %v302_v30  ;;  %v355_v40 = vld [vmem:[#allocation2 + $0x9] sm:$0xff]  ;;  %v309_v0 = vmul.f32 %v674_v55, %v302_v30 }
  0x97   : > { %v375_v45 = vmul.f32 %v372_v32, %v355_v40  ;;  %v407_v46 = vld [vmem:[#allocation2 + $0x2] sm:$0xff]  ;;  %v396_v49 = vmul.f32 %v393_v38, %v355_v40  ;;  %v408_v51 = vld [vmem:[#allocation2 + $0xa] sm:$0xff]  ;;  %v362_v6 = vmul.f32 %v677_v58, %v355_v40 }
  0x98   : > { %346 = vrot.lane.b32.xlu0 %v342_v29, %s759_s9  ;;  %327 = vrot.lane.b32.xlu1 %v322_v33, %s758_s29  ;;  %v427_v48 = vmul.f32 %v425_v47, %v407_v46  ;;  %v448_v52 = vmul.f32 %v446_v50, %v407_v46  ;;  %v428_v53 = vmul.f32 %v425_v47, %v408_v51 }
  0x99   : > { %v449_v54 = vmul.f32 %v446_v50, %v408_v51  ;;  %v414_v13 = vmul.f32 %v680_v7, %v407_v46  ;;  %v415_v19 = vmul.f32 %v680_v7, %v408_v51 }
  0x9c   : > { %378 = vrot.lane.b32.xlu0 %v374_v37, %s758_s29  ;;  %348 = vrot.lane.b32.xlu1 %v343_v39, %s759_s9 }
  0xa0   : > { %399 = vrot.lane.b32.xlu0 %v395_v44, %s759_s9  ;;  %380 = vrot.lane.b32.xlu1 %v375_v45, %s758_s29 }
  0xa4   : > { %431 = vrot.lane.b32.xlu0 %v427_v48, %s758_s29  ;;  %401 = vrot.lane.b32.xlu1 %v396_v49, %s759_s9 }
  0xa8   : > { %452 = vrot.lane.b32.xlu0 %v448_v52, %s759_s9  ;;  %433 = vrot.lane.b32.xlu1 %v428_v53, %s758_s29 }
  0xac   : > { %454 = vrot.lane.b32.xlu1 %v449_v54, %s759_s9 }
 0x106   : > { %v326_v56 = vpop.permute.xlu0 %325 }
 0x107   : > { %v331_v59 = vadd.f32 %v326_v56, %v308_v57 }
 0x10a   : > { %v347_v60 = vpop.permute.xlu0 %346  ;;  %v328_v61 = vpop.permute.xlu1 %327 }
 0x10b   : > { %v352_v62 = vadd.f32 %v347_v60, %v331_v59  ;;  %v332_v2 = vadd.f32 %v328_v61, %v309_v0 }
 0x10d   : > { %v363_v1 = vadd.f32 %v361_v63, %v352_v62 }
 0x10e   : > { %v379_v3 = vpop.permute.xlu0 %378  ;;  %v349_v4 = vpop.permute.xlu1 %348 }
 0x10f   : > { %v353_v5 = vadd.f32 %v349_v4, %v332_v2  ;;  %v384_v8 = vadd.f32 %v379_v3, %v363_v1 }
 0x111   : > { %v364_v9 = vadd.f32 %v362_v6, %v353_v5 }
 0x112   : > { %v400_v10 = vpop.permute.xlu0 %399  ;;  %v381_v11 = vpop.permute.xlu1 %380 }
 0x113   : > { %v405_v12 = vadd.f32 %v400_v10, %v384_v8  ;;  %v385_v15 = vadd.f32 %v381_v11, %v364_v9 }
 0x115   : > { %v416_v14 = vadd.f32 %v414_v13, %v405_v12 }
 0x116   : > { %v432_v16 = vpop.permute.xlu0 %431  ;;  %v402_v17 = vpop.permute.xlu1 %401 }
 0x117   : > { %v406_v18 = vadd.f32 %v402_v17, %v385_v15  ;;  %v437_v20 = vadd.f32 %v432_v16, %v416_v14 }
 0x119   : > { %v417_v21 = vadd.f32 %v415_v19, %v406_v18 }
 0x11a   : > { %v453_v22 = vpop.permute.xlu0 %452  ;;  %v434_v23 = vpop.permute.xlu1 %433 }
 0x11b   : > { %v458_v24 = vadd.f32 %v453_v22, %v437_v20  ;;  %v438_v25 = vadd.f32 %v434_v23, %v417_v21 }
 0x11d   : > { %715 = vmatprep.mubr.msk.f32.mxu0 %vm468_vm3, %v458_v24 }
 0x11e   : > { %v455_v26 = vpop.permute.xlu1 %454 }
 0x11f   : > { %v459_v27 = vadd.f32 %v455_v26, %v438_v25 }
 0x121   : > { %716 = vmatmul.mubr.msk.f32.vlgmr.msra.gmra.mrb[0].mxu0 %vm468_vm3, %v459_v27 }
 0x1f4   : > { %v717_v28 = vpop.f32.mrb[0].mxu0 }
 0x1f5   : > { %551 = vst.msk [vmem:[%s258_s25 + $0x8] sm:$0xff] %vm468_vm3, %v717_v28  ;;  %v553_v29 = vsel %vm468_vm3, %v717_v28, 0.0  ;;  %v562_v30 = vmul.f32 %v717_v28, %v717_v28  ;;  %v541_v31 = vpop.f32.mrb[1].mxu0 }
 0x1f6   : > { %550 = vst.msk [vmem:[%s258_s25] sm:$0xff] %vm468_vm3, %v541_v31  ;;  %v552_v32 = vsel %vm468_vm3, %v541_v31, 0.0  ;;  %v561_v33 = vmul.f32 %v541_v31, %v541_v31 }
 0x1f7   : > { %v564_v34 = vsel %vm468_vm3, %v562_v30, 0.0  ;;  %v554_v35 = vadd.f32 %v553_v29, %v552_v32 }
 0x1f8   : > { %v563_v36 = vsel %vm468_vm3, %v561_v33, 0.0 }
 0x1f9   : > { %v555_v37 = vrot.slane %v554_v35, 4  ;;  %v565_v38 = vadd.f32 %v564_v34, %v563_v36 }
 0x1fb   : > { %v556_v39 = vadd.f32 %v555_v37, %v554_v35  ;;  %v566_v40 = vrot.slane %v565_v38, 4 }
 0x1fd   : > { %v557_v41 = vrot.slane %v556_v39, 2  ;;  %v567_v42 = vadd.f32 %v566_v40, %v565_v38 }
 0x1ff   : > { %v558_v43 = vadd.f32 %v557_v41, %v556_v39  ;;  %v568_v44 = vrot.slane %v567_v42, 2 }
 0x201   : > { %v559_v45 = vrot.slane %v558_v43, 1  ;;  %v569_v46 = vadd.f32 %v568_v44, %v567_v42 }
 0x203   : > { %v570_v47 = vrot.slane %v569_v46, 1  ;;  %v560_v48 = vadd.f32 %v559_v45, %v558_v43 }
 0x205   : > { %v571_v49 = vadd.f32 %v570_v47, %v569_v46 }
 0x207   : > { %v573_v50 = vsel %vm572_vm4, %v560_v48, %v571_v49 }
 0x208   : > { %575 = vst.msk [vmem:[%s262_s8] sm:$0x3] %vm574_vm5, %v573_v50 }
 0x209 PF: > { %s17_s21 = sadd.s32 1, %s753_s21  }
 0x20a   : > { %p14_p4 = scmp.ge.s32.totalorder %s17_s21, 4  }
 0x20c   :  { %16 = sbr.rel (!%p14_p4) target bundleno = 1 (0x1), region = 82 }

// kernel: sepconv_forward.4
= control target key start
LH: loop header
LB: loop body
LE: loop exit
PB: predicated region body
PF: predicated region fallthrough
CT: control target
= control target key end

     0   :  { %s790_s21 = smov 0   ;;  %s892_s0 = inlined_call_operand.vmem [shape: f32[2,16,64], index: 0, kind: input, shape index: {}]   ;;  %s893_s1 = inlined_call_operand.vmem [shape: f32[1,64], index: 1, kind: input, shape index: {}]   ;;  %s894_s2 = inlined_call_operand.vmem [shape: f32[1,64], index: 2, kind: input, shape index: {}]   ;;  %s895_s3 = inlined_call_operand.vmem [shape: f32[9,64], index: 3, kind: input, shape index: {}]   ;;  %s896_s4 = inlined_call_operand.vmem [shape: f32[64,128], index: 4, kind: input, shape index: {}]   ;;  %s897_s5 = inlined_call_operand.vmem [shape: f32[2,16,128], index: 5, kind: output, shape index: {0}]   ;;  %s898_s6 = inlined_call_operand.vmem [shape: f32[2,2,128], index: 6, kind: output, shape index: {1}]  }
   0x1 LB: > { %s657_s22 = sadd.s32 4294967295, %s748_s21   ;;  %p661_p0 = scmp.ge.s32.totalorder %s748_s21, 1  ;;  %s748_s21 = sphi %s790_s21, %s17_s21  }
   0x2   : > { %p215_p1 = scmp.lt.s32.totalorder %s748_s21, 3 }
   0x4   : > { %p216_p2 = pnand %p661_p0, %p215_p1 }
   0x5   : > { %v670_v0 = vld [vmem:[%s895_s3 + $0x1] ss:$0 sm:$0xff] (!%p216_p2)  ;;  %p249_p3 = scmp.lt.s32.totalorder (!%p216_p2), %s657_s22, 1  ;;  %s750_s25 = smov (!%p216_p2), 4   ;;  %vm285_vm0 = vcmask (!%p216_p2), 588800   ;;  %v751_v2 = vmov (!%p216_p2), 0.0  }
   0x6   : > { %219 = sbr.rel (%p216_p2) target bundleno = 520 (0x208), region = 40  ;;  %318 = vrot.lane.b32.xlu1 (!%p216_p2), %v670_v0, %s750_s25  ;;  %v671_v1 = vld [vmem:[%s895_s3 + $0x2] ss:$0 sm:$0xff] (!%p216_p2)  ;;  %286 = vst.msk [vmem:[#allocation2] sm:$0xff] (!%p216_p2), %vm285_vm0, %v751_v2  ;;  %287 = vst.msk [vmem:[#allocation2 + $0x8] sm:$0xff] (!%p216_p2), %vm285_vm0, %v751_v2  ;;  %vm288_vm1 = vcmask (!%p216_p2), 582656  }
   0x7   : > { %v667_v3 = vld [vmem:[%s893_s1] ss:$0 sm:$0xff] (!%p216_p2)  ;;  %289 = vst.msk [vmem:[#allocation2 + $0x10] sm:$0x3] (!%p216_p2), %vm288_vm1, %v751_v2  ;;  %s752_s12 = smov (!%p216_p2), 8   ;;  %vm298_vm2 = vcmask (!%p216_p2), 556064  }
   0x8   : > { %v668_v4 = vld [vmem:[%s894_s2] ss:$0 sm:$0xff] (!%p216_p2)  ;;  %v674_v7 = vld [vmem:[%s895_s3 + $0x5] ss:$0 sm:$0xff] (!%p216_p2)  ;;  %v677_v12 = vld [vmem:[%s895_s3 + $0x8] ss:$0 sm:$0xff] (!%p216_p2) }
   0x9   : > { %v673_v15 = vld [vmem:[%s895_s3 + $0x4] ss:$0 sm:$0xff] (!%p216_p2)  ;;  %v676_v16 = vld [vmem:[%s895_s3 + $0x7] ss:$0 sm:$0xff] (!%p216_p2)  ;;  %v461_v21 = vld [vmem:[%s896_s4 + $0x8] sm:$0xff] (!%p216_p2)  ;;  %s753_s29 = smov (!%p216_p2), 124  }
   0xa   : > { %339 = vrot.lane.b32.xlu1 (!%p216_p2), %v671_v1, %s752_s12  ;;  %v460_v20 = vld [vmem:[%s896_s4] sm:$0xff] (!%p216_p2)  ;;  %v462_v25 = vld [vmem:[%s896_s4 + $0x10] sm:$0xff] (!%p216_p2)  ;;  %v463_v26 = vld [vmem:[%s896_s4 + $0x18] sm:$0xff] (!%p216_p2)  ;;  %vm468_vm3 = vcmask (!%p216_p2), 523264   ;;  %vm568_vm4 = vcmask (!%p216_p2), 1040384  }
   0xb   : > { %v713_v23 = vpack.c.bf16 (!%p216_p2), %v461_v21, %v460_v20  ;;  %v717_v28 = vpack.c.bf16 (!%p216_p2), %v463_v26, %v462_v25  ;;  %v464_v34 = vld [vmem:[%s896_s4 + $0x20] sm:$0xff] (!%p216_p2)  ;;  %v465_v35 = vld [vmem:[%s896_s4 + $0x28] sm:$0xff] (!%p216_p2)  ;;  %v466_v41 = vld [vmem:[%s896_s4 + $0x30] sm:$0xff] (!%p216_p2) }
   0xc   : > { %v721_v36 = vpack.c.bf16 (!%p216_p2), %v465_v35, %v464_v34  ;;  %v467_v42 = vld [vmem:[%s896_s4 + $0x38] sm:$0xff] (!%p216_p2)  ;;  %v669_v55 = vld [vmem:[%s895_s3] ss:$0 sm:$0xff] (!%p216_p2)  ;;  %v672_v58 = vld [vmem:[%s895_s3 + $0x3] ss:$0 sm:$0xff] (!%p216_p2) }
   0xd   : > { %s900_s22 = smov (!%p249_p3, %s657_s22), 1  ;;  %714 = vmatprep.subr.bf16.mxu0 %v713_v23  ;;  %v725_v43 = vpack.c.bf16 %v467_v42, %v466_v41 }
   0xe   : > { %s682_s28 = sshll.u32 %s900_s22, 4  ;;  %392 = vrot.lane.b32.xlu1 %v674_v7, %s752_s12  ;;  %716 = vmatpush3.bf16.msra.mxu0 %v713_v23  ;;  %v675_v7 = vld [vmem:[%s895_s3 + $0x6] ss:$0 sm:$0xff]  ;;  %s666_s30 = sshll.u32 %s900_s22, 1 }
   0xf   : > { %s253_s9 = scalar_lea.vmem %s892_s0, %s682_s28  ;;  %718 = vmatprep.subr.bf16.mxu0 %v717_v28  ;;  %s262_s8 = scalar_lea.vmem %s898_s6, %s666_s30 }
  0x10   : > { %v263_v5 = vld [vmem:[%s253_s9] sm:$0xff]  ;;  %v264_v6 = vld [vmem:[%s253_s9 + $0x8] sm:$0xff]  ;;  %s754_s9 = smov 120  }
  0x11   : > { %v272_v8 = vmul.f32 %v667_v3, %v263_v5  ;;  %v273_v9 = vmul.f32 %v667_v3, %v264_v6 }
  0x12   : > { %445 = vrot.lane.b32.xlu1 %v677_v12, %s752_s12  ;;  %720 = vmatpush3.bf16.msra.mxu0 %v717_v28 }
  0x13   : > { %v281_v10 = vadd.f32 %v668_v4, %v272_v8  ;;  %v282_v11 = vadd.f32 %v668_v4, %v273_v9  ;;  %722 = vmatprep.subr.bf16.mxu0 %v721_v36 }
  0x15   : > { %v283_v13 = vmax.f32 %v281_v10, 0.0  ;;  %v284_v14 = vmax.f32 %v282_v11, 0.0 }
  0x16   : > { %724 = vmatpush3.bf16.msra.mxu0 %v721_v36 }
  0x17   : > { %292 = vrot.lane.b32.xlu0 %v283_v13, %s750_s25  ;;  %726 = vmatprep.subr.bf16.mxu0 %v725_v43 }
  0x1a   : > { %728 = vmatpush3.bf16.msra.mxu0 %v725_v43 }
  0x1b   : > { %294 = vrot.lane.b32.xlu0 %v284_v14, %s750_s25 }
  0x1f   : > { %371 = vrot.lane.b32.xlu0 %v673_v15, %s750_s25 }
  0x23   : > { %424 = vrot.lane.b32.xlu0 %v676_v16, %s750_s25  ;;  %s258_s25 = scalar_lea.vmem %s897_s5, %s682_s28 }
  0x78   : > { %v319_v19 = vpop.permute.xlu1 %318 }
  0x7c   : > { %v340_v27 = vpop.permute.xlu1 %339 }
  0x80   : > { %v393_v38 = vpop.permute.xlu1 %392 }
  0x84   : > { %v446_v50 = vpop.permute.xlu1 %445 }
  0x89   : > { %v293_v17 = vpop.permute.xlu0 %292 }
  0x8a   : > { %299 = vst.msk [vmem:[#allocation2 + $0x1] sm:$0xff] %vm298_vm2, %v293_v17 }
  0x8d   : > { %v295_v18 = vpop.permute.xlu0 %294 }
  0x8e   : > { %300 = vst.msk [vmem:[#allocation2 + $0x9] sm:$0xff] %vm298_vm2, %v295_v18 }
  0x91   : > { %v301_v22 = vld [vmem:[#allocation2] sm:$0xff]  ;;  %v372_v32 = vpop.permute.xlu0 %371 }
  0x92   : > { %v321_v24 = vmul.f32 %v319_v19, %v301_v22  ;;  %v342_v29 = vmul.f32 %v340_v27, %v301_v22  ;;  %v354_v31 = vld [vmem:[#allocation2 + $0x1] sm:$0xff]  ;;  %v308_v57 = vmul.f32 %v669_v55, %v301_v22 }
  0x93   : > { %v374_v37 = vmul.f32 %v372_v32, %v354_v31  ;;  %v395_v44 = vmul.f32 %v393_v38, %v354_v31  ;;  %v361_v63 = vmul.f32 %v672_v58, %v354_v31 }
  0x94   : > { %325 = vrot.lane.b32.xlu0 %v321_v24, %s753_s29 }
  0x95   : > { %v302_v30 = vld [vmem:[#allocation2 + $0x8] sm:$0xff]  ;;  %v425_v47 = vpop.permute.xlu0 %424 }
  0x96   : > { %v322_v33 = vmul.f32 %v319_v19, %v302_v30  ;;  %v343_v39 = vmul.f32 %v340_v27, %v302_v30  ;;  %v355_v40 = vld [vmem:[#allocation2 + $0x9] sm:$0xff]  ;;  %v309_v0 = vmul.f32 %v669_v55, %v302_v30 }
  0x97   : > { %v375_v45 = vmul.f32 %v372_v32, %v355_v40  ;;  %v407_v46 = vld [vmem:[#allocation2 + $0x2] sm:$0xff]  ;;  %v396_v49 = vmul.f32 %v393_v38, %v355_v40  ;;  %v408_v51 = vld [vmem:[#allocation2 + $0xa] sm:$0xff]  ;;  %v362_v6 = vmul.f32 %v672_v58, %v355_v40 }
  0x98   : > { %346 = vrot.lane.b32.xlu0 %v342_v29, %s754_s9  ;;  %327 = vrot.lane.b32.xlu1 %v322_v33, %s753_s29  ;;  %v427_v48 = vmul.f32 %v425_v47, %v407_v46  ;;  %v448_v52 = vmul.f32 %v446_v50, %v407_v46  ;;  %v428_v53 = vmul.f32 %v425_v47, %v408_v51 }
  0x99   : > { %v449_v54 = vmul.f32 %v446_v50, %v408_v51  ;;  %v414_v13 = vmul.f32 %v675_v7, %v407_v46  ;;  %v415_v19 = vmul.f32 %v675_v7, %v408_v51 }
  0x9c   : > { %378 = vrot.lane.b32.xlu0 %v374_v37, %s753_s29  ;;  %348 = vrot.lane.b32.xlu1 %v343_v39, %s754_s9 }
  0xa0   : > { %399 = vrot.lane.b32.xlu0 %v395_v44, %s754_s9  ;;  %380 = vrot.lane.b32.xlu1 %v375_v45, %s753_s29 }
  0xa4   : > { %431 = vrot.lane.b32.xlu0 %v427_v48, %s753_s29  ;;  %401 = vrot.lane.b32.xlu1 %v396_v49, %s754_s9 }
  0xa8   : > { %452 = vrot.lane.b32.xlu0 %v448_v52, %s754_s9  ;;  %433 = vrot.lane.b32.xlu1 %v428_v53, %s753_s29 }
  0xac   : > { %454 = vrot.lane.b32.xlu1 %v449_v54, %s754_s9 }
 0x106   : > { %v326_v56 = vpop.permute.xlu0 %325 }
 0x107   : > { %v331_v59 = vadd.f32 %v326_v56, %v308_v57 }
 0x10a   : > { %v347_v60 = vpop.permute.xlu0 %346  ;;  %v328_v61 = vpop.permute.xlu1 %327 }
 0x10b   : > { %v352_v62 = vadd.f32 %v347_v60, %v331_v59  ;;  %v332_v2 = vadd.f32 %v328_v61, %v309_v0 }
 0x10d   : > { %v363_v1 = vadd.f32 %v361_v63, %v352_v62 }
 0x10e   : > { %v379_v3 = vpop.permute.xlu0 %378  ;;  %v349_v4 = vpop.permute.xlu1 %348 }
 0x10f   : > { %v353_v5 = vadd.f32 %v349_v4, %v332_v2  ;;  %v384_v8 = vadd.f32 %v379_v3, %v363_v1 }
 0x111   : > { %v364_v9 = vadd.f32 %v362_v6, %v353_v5 }
 0x112   : > { %v400_v10 = vpop.permute.xlu0 %399  ;;  %v381_v11 = vpop.permute.xlu1 %380 }
 0x113   : > { %v405_v12 = vadd.f32 %v400_v10, %v384_v8  ;;  %v385_v15 = vadd.f32 %v381_v11, %v364_v9 }
 0x115   : > { %v416_v14 = vadd.f32 %v414_v13, %v405_v12 }
 0x116   : > { %v432_v16 = vpop.permute.xlu0 %431  ;;  %v402_v17 = vpop.permute.xlu1 %401 }
 0x117   : > { %v406_v18 = vadd.f32 %v402_v17, %v385_v15  ;;  %v437_v20 = vadd.f32 %v432_v16, %v416_v14 }
 0x119   : > { %v417_v21 = vadd.f32 %v415_v19, %v406_v18 }
 0x11a   : > { %v453_v22 = vpop.permute.xlu0 %452  ;;  %v434_v23 = vpop.permute.xlu1 %433 }
 0x11b   : > { %v458_v24 = vadd.f32 %v453_v22, %v437_v20  ;;  %v438_v25 = vadd.f32 %v434_v23, %v417_v21 }
 0x11d   : > { %710 = vmatprep.mubr.msk.f32.mxu0 %vm468_vm3, %v458_v24 }
 0x11e   : > { %v455_v26 = vpop.permute.xlu1 %454 }
 0x11f   : > { %v459_v27 = vadd.f32 %v455_v26, %v438_v25 }
 0x121   : > { %711 = vmatmul.mubr.msk.f32.vlgmr.msra.gmra.mrb[0].mxu0 %vm468_vm3, %v459_v27 }
 0x1f4   : > { %v712_v28 = vpop.f32.mrb[0].mxu0 }
 0x1f5   : > { %v560_v29 = vmul.f32 %v712_v28, %v712_v28  ;;  %v541_v30 = vpop.f32.mrb[1].mxu0  ;;  %551 = vst [vmem:[%s258_s25 + $0x8] sm:$0xff] %v712_v28 }
 0x1f6   : > { %550 = vst [vmem:[%s258_s25] sm:$0xff] %v541_v30  ;;  %v552_v31 = vadd.f32 %v712_v28, %v541_v30  ;;  %v559_v32 = vmul.f32 %v541_v30, %v541_v30 }
 0x1f8   : > { %v553_v33 = vrot.slane %v552_v31, 4  ;;  %v561_v34 = vadd.f32 %v560_v29, %v559_v32 }
 0x1fa   : > { %v554_v35 = vadd.f32 %v553_v33, %v552_v31  ;;  %v562_v36 = vrot.slane %v561_v34, 4 }
 0x1fc   : > { %v555_v37 = vrot.slane %v554_v35, 2  ;;  %v563_v38 = vadd.f32 %v562_v36, %v561_v34 }
 0x1fe   : > { %v556_v39 = vadd.f32 %v555_v37, %v554_v35  ;;  %v564_v40 = vrot.slane %v563_v38, 2 }
 0x200   : > { %v557_v41 = vrot.slane %v556_v39, 1  ;;  %v565_v42 = vadd.f32 %v564_v40, %v563_v38 }
 0x202   : > { %v566_v43 = vrot.slane %v565_v42, 1  ;;  %v558_v44 = vadd.f32 %v557_v41, %v556_v39 }
 0x204   : > { %v567_v45 = vadd.f32 %v566_v43, %v565_v42 }
 0x206   : > { %v569_v46 = vsel %vm568_vm4, %v558_v44, %v567_v45 }
 0x207   : > { %570 = vst [vmem:[%s262_s8] sm:$0x3] %v569_v46 }
 0x208 PF: > { %s17_s21 = sadd.s32 1, %s748_s21  }
 0x209   : > { %p14_p4 = scmp.ge.s32.totalorder %s17_s21, 4  }
 0x20b   :  { %16 = sbr.rel (!%p14_p4) target bundleno = 1 (0x1), region = 82 }

// kernel: sepconv_forward.5
= control target key start
LH: loop header
LB: loop body
LE: loop exit
PB: predicated region body
PF: predicated region fallthrough
CT: control target
= control target key end

     0   :  { %s100_s0 = inlined_call_operand.vmem [shape: f32[32,128], index: 0, kind: input, shape index: {}]   ;;  %s101_s1 = inlined_call_operand.vmem [shape: f32[1,128], index: 1, kind: input, shape index: {}]   ;;  %s102_s2 = inlined_call_operand.vmem [shape: f32[1,128], index: 2, kind: input, shape index: {}]   ;;  %s103_s3 = inlined_call_operand.vmem [shape: f32[32,128], index: 3, kind: output, shape index: {}]  }
   0x1   :  { %v14_v0 = vld [vmem:[%s100_s0] sm:$0xff]  ;;  %v15_v4 = vld [vmem:[%s100_s0 + $0x8] sm:$0xff]  ;;  %v16_v5 = vld [vmem:[%s100_s0 + $0x10] sm:$0xff] }
   0x2   :  { %v48_v1 = vld [vmem:[%s101_s1] ss:$0 sm:$0xff]  ;;  %v17_v6 = vld [vmem:[%s100_s0 + $0x18] sm:$0xff] }
   0x3   :  { %v49_v2 = vld [vmem:[%s102_s2] ss:$0 sm:$0xff]  ;;  %v25_v3 = vmul.f32 %v48_v1, %v14_v0  ;;  %v26_v7 = vmul.f32 %v48_v1, %v15_v4  ;;  %v27_v8 = vmul.f32 %v48_v1, %v16_v5  ;;  %v28_v9 = vmul.f32 %v48_v1, %v17_v6 }
   0x5   :  { %v36_v10 = vadd.f32 %v49_v2, %v25_v3  ;;  %v37_v11 = vadd.f32 %v49_v2, %v26_v7  ;;  %v38_v12 = vadd.f32 %v49_v2, %v27_v8  ;;  %v39_v13 = vadd.f32 %v49_v2, %v28_v9 }
   0x7   :  { %40 = vst [vmem:[%s103_s3] sm:$0xff] %v36_v10  ;;  %41 = vst [vmem:[%s103_s3 + $0x8] sm:$0xff] %v37_v11 }
   0x8   :  { %42 = vst [vmem:[%s103_s3 + $0x10] sm:$0xff] %v38_v12  ;;  %43 = vst [vmem:[%s103_s3 + $0x18] sm:$0xff] %v39_v13 }

</bundles_post_ra>
